<compile_context>
chip_gen: v7x
topology: tpu7x:2x2x1
jax: 0.10.0
libtpu: 0.0.40
codegen_flags: <defaults>
</compile_context>

<pallas_src>
import math

import jax
import jax.numpy as jnp
from jax.experimental import pallas as pl
from jax.experimental.pallas import tpu as pltpu

_HI = jax.lax.Precision.HIGHEST
_EPS = 1e-4


# ---------------------------------------------------------------------------
# Parameter init: gaussian orthogonal random matrix (performer-pytorch, scaling=0)
# ---------------------------------------------------------------------------
def gaussian_orthogonal_random_matrix(key, nb_rows, nb_columns):
    nb_full_blocks = nb_rows // nb_columns
    keys = jax.random.split(key, nb_full_blocks + 2)
    blocks = []
    for i in range(nb_full_blocks):
        g = jax.random.normal(keys[i], (nb_columns, nb_columns), dtype=jnp.float32)
        q, _ = jnp.linalg.qr(g)
        blocks.append(q.T)
    rem = nb_rows - nb_full_blocks * nb_columns
    if rem > 0:
        g = jax.random.normal(keys[nb_full_blocks], (nb_columns, nb_columns),
                              dtype=jnp.float32)
        q, _ = jnp.linalg.qr(g)
        blocks.append(q.T[:rem])
    final = jnp.concatenate(blocks, axis=0)
    multiplier = jnp.linalg.norm(
        jax.random.normal(keys[-1], (nb_rows, nb_columns), dtype=jnp.float32), axis=1)
    return multiplier[:, None] * final  # [nb_rows, nb_columns]


# ---------------------------------------------------------------------------
# Pallas kernel: one batch element per grid step, head-packed lane-dense layout.
# ---------------------------------------------------------------------------
def _performer_kernel(q_ref, k_ref, v_ref, wp_ref, wd_ref, s_ref, o_ref):
    # q/k/v: (N, H*D) bf16 (mask already folded into K/V in the wrapper).
    # wp/wd: (H*D, H*M) block-diag weights; s: (H*M, H*D) block-diag 0/1 mask.
    q = q_ref[...]
    k = k_ref[...]
    v = v_ref[...]
    wp = wp_ref[...]
    wd = wd_ref[...]
    s = s_ref[...]

    # FAVOR+ feature maps: lane-dense MXU matmuls (f32 accumulation). The diag
    # term comes out of the block-diag ones matmul already broadcast across that
    # head's M feature lanes.
    q_dash = jnp.dot(q, wp, preferred_element_type=jnp.float32)       # (N, H*M)
    k_dash = jnp.dot(k, wp, preferred_element_type=jnp.float32)       # (N, H*M)
    q_diag = jnp.dot(q * q, wd, preferred_element_type=jnp.float32)   # (N, H*M)
    k_diag = jnp.dot(k * k, wd, preferred_element_type=jnp.float32)   # (N, H*M)

    # Stabilizers: row max over all heads (q) / block max (k). Any per-(row,head)
    # constant offset cancels in the final normalization (only eps weighting
    # shifts by a negligible amount), so the global max is safe and avoids
    # segmented lane reductions.
    q_max = jnp.max(q_dash, axis=-1, keepdims=True)                               # (N, 1)
    k_max = jnp.max(jnp.max(k_dash, axis=0, keepdims=True), axis=1, keepdims=True)  # (1, 1)

    # ratio = M**-0.5 dropped: it cancels exactly between numerator and denominator.
    qp = jnp.exp(q_dash - q_diag - q_max) + _EPS                      # (N, H*M) f32
    kp = jnp.exp(k_dash - k_diag - k_max) + _EPS                      # (N, H*M) f32

    qp_b = qp.astype(jnp.bfloat16)
    kp_b = kp.astype(jnp.bfloat16)

    # Per-head context as one packed (H*M, H*D) matmul; cross-head blocks are
    # zeroed with the block-diag mask s before the second matmul.
    ctx = jnp.einsum('nm,nd->md', kp_b, v, preferred_element_type=jnp.float32)
    ctx = (ctx * s).astype(jnp.bfloat16)                              # (H*M, H*D)
    num = jnp.dot(qp_b, ctx, preferred_element_type=jnp.float32)      # (N, H*D)

    # Denominator: per-head sum over that head's M feature lanes, broadcast over
    # its D output lanes — segmented reduction expressed as a matmul with s.
    k_cumsum = jnp.sum(kp, axis=0, keepdims=True)                     # (1, H*M)
    t = (qp * k_cumsum).astype(jnp.bfloat16)                          # (N, H*M)
    den = jnp.dot(t, s, preferred_element_type=jnp.float32)           # (N, H*D)

    o_ref[...] = (num * pl.reciprocal(den, approx=True)).astype(o_ref.dtype)


def performer_attention(Q, K, V, mask, proj):
    """Q,K,V: [B,H,N,D]; mask: [B,N]; proj: [M,D] -> out: [B,H,N,D]."""
    B, H, N, D = Q.shape
    M = proj.shape[0]
    HD, HM = H * D, H * M

    # Head-packed [B, N, H*D] bf16 inputs: lane-dense operands/outputs and half
    # the HBM->VMEM DMA volume. Mask folded into K/V; scales folded into weights.
    m = mask.astype(jnp.float32)[:, :, None, None]                    # [B, N, 1, 1]
    Qp = jnp.transpose(Q, (0, 2, 1, 3)).reshape(B, N, HD).astype(jnp.bfloat16)
    Kp = (jnp.transpose(K, (0, 2, 1, 3)) * m).reshape(B, N, HD).astype(jnp.bfloat16)
    Vp = (jnp.transpose(V, (0, 2, 1, 3)) * m).reshape(B, N, HD).astype(jnp.bfloat16)

    eye = jnp.eye(H, dtype=jnp.float32)
    dn2 = float(D) ** -0.5  # forward()'s D^-1/4 times softmax_kernel's data_normalizer
    Wp = jnp.kron(eye, (proj.T.astype(jnp.float32) * dn2)).astype(jnp.bfloat16)    # [HD, HM]
    Wd = jnp.kron(eye, jnp.full((D, M), 0.5 / D, jnp.float32)).astype(jnp.bfloat16)  # [HD, HM]
    S = jnp.kron(eye, jnp.ones((M, D), jnp.float32)).astype(jnp.bfloat16)            # [HM, HD]

    out = pl.pallas_call(
        _performer_kernel,
        out_shape=jax.ShapeDtypeStruct((B, N, HD), Q.dtype),
        grid_spec=pltpu.PrefetchScalarGridSpec(
            num_scalar_prefetch=0,
            grid=(B,),
            in_specs=[
                pl.BlockSpec((None, N, HD), lambda b: (b, 0, 0)),   # Q packed
                pl.BlockSpec((None, N, HD), lambda b: (b, 0, 0)),   # K packed (masked)
                pl.BlockSpec((None, N, HD), lambda b: (b, 0, 0)),   # V packed (masked)
                pl.BlockSpec((HD, HM), lambda b: (0, 0)),           # block-diag proj
                pl.BlockSpec((HD, HM), lambda b: (0, 0)),           # block-diag diag-ones
                pl.BlockSpec((HM, HD), lambda b: (0, 0)),           # block-diag segment mask
            ],
            out_specs=pl.BlockSpec((None, N, HD), lambda b: (b, 0, 0)),
        ),
        compiler_params=pltpu.CompilerParams(
            dimension_semantics=("parallel",),
            vmem_limit_bytes=32 * 1024 * 1024),
    )(Qp, Kp, Vp, Wp, Wd, S)

    # Back to the module's [B, H, N, D] output layout (store itself was lane-dense).
    return jnp.transpose(out.reshape(B, N, H, D), (0, 2, 1, 3))


# ---------------------------------------------------------------------------
# Pure-JAX reference (mirrors performer-pytorch softmax_kernel + linear_attention)
# ---------------------------------------------------------------------------
def performer_attention_ref(Q, K, V, mask, proj):
    D = Q.shape[-1]
    M = proj.shape[0]
    outer_scale = 1.0 / math.sqrt(math.sqrt(D))
    dn = float(D) ** -0.25
    ratio = float(M) ** -0.5
    m = mask[:, None, :, None]
    q = Q * outer_scale
    k = K * outer_scale * m
    v = V * m

    q_dash = jnp.einsum('bhnd,md->bhnm', q * dn, proj, precision=_HI)
    k_dash = jnp.einsum('bhnd,md->bhnm', k * dn, proj, precision=_HI)
    q_diag = 0.5 * dn ** 2 * jnp.sum(q * q, axis=-1, keepdims=True)
    k_diag = 0.5 * dn ** 2 * jnp.sum(k * k, axis=-1, keepdims=True)
    qp = ratio * (jnp.exp(q_dash - q_diag - jnp.max(q_dash, axis=-1, keepdims=True)) + _EPS)
    kp = ratio * (jnp.exp(k_dash - k_diag
                          - jnp.max(k_dash, axis=(-1, -2), keepdims=True)) + _EPS)

    k_cumsum = kp.sum(axis=-2)
    d_inv = 1.0 / jnp.einsum('bhnm,bhm->bhn', qp, k_cumsum, precision=_HI)
    context = jnp.einsum('bhnm,bhnd->bhmd', kp, v, precision=_HI)
    out = jnp.einsum('bhnm,bhmd->bhnd', qp, context, precision=_HI)
    return out * d_inv[..., None]


if __name__ == "__main__":
    # config: head_dim=32, rp_dim=64, kernel_type='exp' (softmax-kernel path)
    B, H, N, D, M = 2, 4, 128, 32, 64
    key = jax.random.PRNGKey(0)
    kq, kk, kv, km, kp = jax.random.split(key, 5)
    Q = jax.random.normal(kq, (B, H, N, D), dtype=jnp.float32)
    K = jax.random.normal(kk, (B, H, N, D), dtype=jnp.float32)
    V = jax.random.normal(kv, (B, H, N, D), dtype=jnp.float32)
    mask = (jax.random.uniform(km, (B, N)) > 0.25).astype(jnp.float32)
    proj = gaussian_orthogonal_random_matrix(kp, M, D)

    out = jax.block_until_ready(performer_attention(Q, K, V, mask, proj))
    ref = performer_attention_ref(Q, K, V, mask, proj)

    assert out.shape == (B, H, N, D)
    max_err = float(jnp.max(jnp.abs(out - ref)))
    # Tolerance vs the f32-HIGHEST reference covers bf16 MXU operands (f32
    # accumulation), the approx EUP reciprocal, and the global-max / dropped-ratio
    # reformulation (mathematically equivalent up to eps weighting).
    assert jnp.allclose(out, ref, atol=2e-2, rtol=2e-2), f"max abs err {max_err}"
    print("KERNEL_OK")
</pallas_src>

<mosaic_0001>
module attributes {stable_mosaic.version = 11 : i64} {
  func.func @_performer_kernel(%arg0: i32, %arg1: memref<1x128x128xbf16, #tpu.memory_space<vmem>>, %arg2: memref<1x128x128xbf16, #tpu.memory_space<vmem>>, %arg3: memref<1x128x128xbf16, #tpu.memory_space<vmem>>, %arg4: memref<128x256xbf16, #tpu.memory_space<vmem>>, %arg5: memref<128x256xbf16, #tpu.memory_space<vmem>>, %arg6: memref<256x128xbf16, #tpu.memory_space<vmem>>, %arg7: memref<1x128x128xf32, #tpu.memory_space<vmem>>) attributes {dimension_semantics = [#tpu.dimension_semantics<parallel>], iteration_bounds = array<i64: 2>, scalar_prefetch = 0 : i64, scratch_operands = 0 : i64, tpu.core_type = #tpu.core_type<tc>, window_params = [{transform_indices = @transform_0, window_bounds = array<i64: 1, 128, 128>}, {transform_indices = @transform_1, window_bounds = array<i64: 1, 128, 128>}, {transform_indices = @transform_2, window_bounds = array<i64: 1, 128, 128>}, {pipeline_mode = #tpu.pipeline_mode<synchronous>, transform_indices = @transform_3, window_bounds = array<i64: 128, 256>}, {pipeline_mode = #tpu.pipeline_mode<synchronous>, transform_indices = @transform_4, window_bounds = array<i64: 128, 256>}, {pipeline_mode = #tpu.pipeline_mode<synchronous>, transform_indices = @transform_5, window_bounds = array<i64: 256, 128>}, {transform_indices = @transform_6, window_bounds = array<i64: 1, 128, 128>}]} {
    %c0 = arith.constant 0 : index
    %c0_0 = arith.constant 0 : index
    %c0_1 = arith.constant 0 : index
    %0 = vector.load %arg1[%c0, %c0_0, %c0_1] : memref<1x128x128xbf16, #tpu.memory_space<vmem>>, vector<1x128x128xbf16>
    %1 = vector.shape_cast %0 : vector<1x128x128xbf16> to vector<128x128xbf16>
    %c0_2 = arith.constant 0 : index
    %c0_3 = arith.constant 0 : index
    %c0_4 = arith.constant 0 : index
    %2 = vector.load %arg2[%c0_2, %c0_3, %c0_4] : memref<1x128x128xbf16, #tpu.memory_space<vmem>>, vector<1x128x128xbf16>
    %3 = vector.shape_cast %2 : vector<1x128x128xbf16> to vector<128x128xbf16>
    %c0_5 = arith.constant 0 : index
    %c0_6 = arith.constant 0 : index
    %c0_7 = arith.constant 0 : index
    %4 = vector.load %arg3[%c0_5, %c0_6, %c0_7] : memref<1x128x128xbf16, #tpu.memory_space<vmem>>, vector<1x128x128xbf16>
    %5 = vector.shape_cast %4 : vector<1x128x128xbf16> to vector<128x128xbf16>
    %c0_8 = arith.constant 0 : index
    %c0_9 = arith.constant 0 : index
    %6 = vector.load %arg4[%c0_8, %c0_9] : memref<128x256xbf16, #tpu.memory_space<vmem>>, vector<128x256xbf16>
    %c0_10 = arith.constant 0 : index
    %c0_11 = arith.constant 0 : index
    %7 = vector.load %arg5[%c0_10, %c0_11] : memref<128x256xbf16, #tpu.memory_space<vmem>>, vector<128x256xbf16>
    %c0_12 = arith.constant 0 : index
    %c0_13 = arith.constant 0 : index
    %8 = vector.load %arg6[%c0_12, %c0_13] : memref<256x128xbf16, #tpu.memory_space<vmem>>, vector<256x128xbf16>
    %cst = arith.constant dense<0.000000e+00> : vector<128x256xf32>
    %9 = tpu.matmul %1, %6, %cst {dimension_numbers = #tpu.dot_dimension_numbers<[1], [0], [0], [1], [0, 0, 1, 1], [], []>} : vector<128x128xbf16>, vector<128x256xbf16>, vector<128x256xf32> -> vector<128x256xf32>
    %cst_14 = arith.constant dense<0.000000e+00> : vector<128x256xf32>
    %10 = tpu.matmul %3, %6, %cst_14 {dimension_numbers = #tpu.dot_dimension_numbers<[1], [0], [0], [1], [0, 0, 1, 1], [], []>} : vector<128x128xbf16>, vector<128x256xbf16>, vector<128x256xf32> -> vector<128x256xf32>
    %11 = arith.mulf %1, %1 : vector<128x128xbf16>
    %cst_15 = arith.constant dense<0.000000e+00> : vector<128x256xf32>
    %12 = tpu.matmul %11, %7, %cst_15 {dimension_numbers = #tpu.dot_dimension_numbers<[1], [0], [0], [1], [0, 0, 1, 1], [], []>} : vector<128x128xbf16>, vector<128x256xbf16>, vector<128x256xf32> -> vector<128x256xf32>
    %13 = arith.mulf %3, %3 : vector<128x128xbf16>
    %cst_16 = arith.constant dense<0.000000e+00> : vector<128x256xf32>
    %14 = tpu.matmul %13, %7, %cst_16 {dimension_numbers = #tpu.dot_dimension_numbers<[1], [0], [0], [1], [0, 0, 1, 1], [], []>} : vector<128x128xbf16>, vector<128x256xbf16>, vector<128x256xf32> -> vector<128x256xf32>
    %cst_17 = arith.constant dense<0xFF800000> : vector<128xf32>
    %15 = vector.multi_reduction <maximumf>, %9, %cst_17 [1] : vector<128x256xf32> to vector<128xf32>
    %16 = vector.shape_cast %15 : vector<128xf32> to vector<128x1xf32>
    %cst_18 = arith.constant dense<0xFF800000> : vector<256xf32>
    %17 = vector.multi_reduction <maximumf>, %10, %cst_18 [0] : vector<128x256xf32> to vector<256xf32>
    %18 = vector.shape_cast %17 : vector<256xf32> to vector<1x256xf32>
    %cst_19 = arith.constant dense<0xFF800000> : vector<1xf32>
    %19 = vector.multi_reduction <maximumf>, %18, %cst_19 [1] : vector<1x256xf32> to vector<1xf32>
    %20 = vector.shape_cast %19 : vector<1xf32> to vector<1x1xf32>
    %21 = arith.subf %9, %12 : vector<128x256xf32>
    %22 = vector.broadcast %16 : vector<128x1xf32> to vector<128x256xf32>
    %23 = arith.subf %21, %22 : vector<128x256xf32>
    %24 = math.exp %23 : vector<128x256xf32>
    %cst_20 = arith.constant 9.99999974E-5 : f32
    %25 = vector.broadcast %cst_20 : f32 to vector<128x256xf32>
    %26 = arith.addf %24, %25 : vector<128x256xf32>
    %27 = arith.subf %10, %14 : vector<128x256xf32>
    %28 = vector.broadcast %20 : vector<1x1xf32> to vector<128x256xf32>
    %29 = arith.subf %27, %28 : vector<128x256xf32>
    %30 = math.exp %29 : vector<128x256xf32>
    %cst_21 = arith.constant 9.99999974E-5 : f32
    %31 = vector.broadcast %cst_21 : f32 to vector<128x256xf32>
    %32 = arith.addf %30, %31 : vector<128x256xf32>
    %33 = arith.truncf %26 : vector<128x256xf32> to vector<128x256xbf16>
    %34 = arith.truncf %32 : vector<128x256xf32> to vector<128x256xbf16>
    "tpu.trace_start"() <{level = 10 : i32, message = "nm,nd->md"}> : () -> ()
    %cst_22 = arith.constant dense<0.000000e+00> : vector<256x128xf32>
    %35 = tpu.matmul %34, %5, %cst_22 {dimension_numbers = #tpu.dot_dimension_numbers<[0], [0], [1], [1], [0, 1, 1, 1], [], []>} : vector<128x256xbf16>, vector<128x128xbf16>, vector<256x128xf32> -> vector<256x128xf32>
    "tpu.trace_stop"() : () -> ()
    %36 = arith.extf %8 : vector<256x128xbf16> to vector<256x128xf32>
    %37 = arith.mulf %35, %36 : vector<256x128xf32>
    %38 = arith.truncf %37 : vector<256x128xf32> to vector<256x128xbf16>
    %cst_23 = arith.constant dense<0.000000e+00> : vector<128x128xf32>
    %39 = tpu.matmul %33, %38, %cst_23 {dimension_numbers = #tpu.dot_dimension_numbers<[1], [0], [0], [1], [0, 0, 1, 1], [], []>} : vector<128x256xbf16>, vector<256x128xbf16>, vector<128x128xf32> -> vector<128x128xf32>
    %cst_24 = arith.constant dense<0.000000e+00> : vector<256xf32>
    %40 = vector.multi_reduction <add>, %32, %cst_24 [0] : vector<128x256xf32> to vector<256xf32>
    %41 = vector.shape_cast %40 : vector<256xf32> to vector<1x256xf32>
    %42 = vector.broadcast %41 : vector<1x256xf32> to vector<128x256xf32>
    %43 = arith.mulf %26, %42 : vector<128x256xf32>
    %44 = arith.truncf %43 : vector<128x256xf32> to vector<128x256xbf16>
    %cst_25 = arith.constant dense<0.000000e+00> : vector<128x128xf32>
    %45 = tpu.matmul %44, %8, %cst_25 {dimension_numbers = #tpu.dot_dimension_numbers<[1], [0], [0], [1], [0, 0, 1, 1], [], []>} : vector<128x256xbf16>, vector<256x128xbf16>, vector<128x128xf32> -> vector<128x128xf32>
    %46 = tpu.reciprocal %45 {approx = true} : vector<128x128xf32> -> vector<128x128xf32>
    %47 = arith.mulf %39, %46 : vector<128x128xf32>
    %c0_26 = arith.constant 0 : index
    %c0_27 = arith.constant 0 : index
    %c0_28 = arith.constant 0 : index
    %48 = vector.load %arg7[%c0_26, %c0_27, %c0_28] : memref<1x128x128xf32, #tpu.memory_space<vmem>>, vector<1x128x128xf32>
    %49 = vector.shape_cast %48 : vector<1x128x128xf32> to vector<128x128xf32>
    %50 = vector.shape_cast %47 : vector<128x128xf32> to vector<1x128x128xf32>
    tpu.vector_store %arg7[%c0_26, %c0_27, %c0_28], %50 {strides = array<i32>} : memref<1x128x128xf32, #tpu.memory_space<vmem>>, vector<1x128x128xf32>,
    return
  }
  func.func @transform_0(%arg0: i32) -> (i32, i32, i32) {
    %c0_i32 = arith.constant 0 : i32
    %c0_i32_0 = arith.constant 0 : i32
    %c0_i32_1 = arith.constant 0 : i32
    return %arg0, %c0_i32, %c0_i32_0 : i32, i32, i32
  }
  func.func @transform_1(%arg0: i32) -> (i32, i32, i32) {
    %c0_i32 = arith.constant 0 : i32
    %c0_i32_0 = arith.constant 0 : i32
    %c0_i32_1 = arith.constant 0 : i32
    return %arg0, %c0_i32, %c0_i32_0 : i32, i32, i32
  }
  func.func @transform_2(%arg0: i32) -> (i32, i32, i32) {
    %c0_i32 = arith.constant 0 : i32
    %c0_i32_0 = arith.constant 0 : i32
    %c0_i32_1 = arith.constant 0 : i32
    return %arg0, %c0_i32, %c0_i32_0 : i32, i32, i32
  }
  func.func @transform_3(%arg0: i32) -> (i32, i32) {
    %c0_i32 = arith.constant 0 : i32
    %c0_i32_0 = arith.constant 0 : i32
    %c0_i32_1 = arith.constant 0 : i32
    return %c0_i32, %c0_i32_0 : i32, i32
  }
  func.func @transform_4(%arg0: i32) -> (i32, i32) {
    %c0_i32 = arith.constant 0 : i32
    %c0_i32_0 = arith.constant 0 : i32
    %c0_i32_1 = arith.constant 0 : i32
    return %c0_i32, %c0_i32_0 : i32, i32
  }
  func.func @transform_5(%arg0: i32) -> (i32, i32) {
    %c0_i32 = arith.constant 0 : i32
    %c0_i32_0 = arith.constant 0 : i32
    %c0_i32_1 = arith.constant 0 : i32
    return %c0_i32, %c0_i32_0 : i32, i32
  }
  func.func @transform_6(%arg0: i32) -> (i32, i32, i32) {
    %c0_i32 = arith.constant 0 : i32
    %c0_i32_0 = arith.constant 0 : i32
    %c0_i32_1 = arith.constant 0 : i32
    return %arg0, %c0_i32, %c0_i32_0 : i32, i32, i32
  }
}

</mosaic_0001>

<bundles_post_ra>
// kernel: tpu_custom_call.1
= control target key start
LH: loop header
LB: loop body
LE: loop exit
PB: predicated region body
PF: predicated region fallthrough
CT: control target
= control target key end

     0   :  { %s5537_s0 = inlined_call_operand.hbm [shape: bf16[2,128,128], index: 0, kind: input, shape index: {}]   ;;  %s5538_s1 = inlined_call_operand.hbm [shape: bf16[2,128,128], index: 1, kind: input, shape index: {}]   ;;  %s5539_s2 = inlined_call_operand.hbm [shape: bf16[2,128,128], index: 2, kind: input, shape index: {}]   ;;  %s5540_s3 = inlined_call_operand.hbm [shape: bf16[128,256], index: 3, kind: input, shape index: {}]   ;;  %s5541_s4 = inlined_call_operand.hbm [shape: bf16[128,256], index: 4, kind: input, shape index: {}]   ;;  %s5542_s5 = inlined_call_operand.hbm [shape: bf16[256,128], index: 5, kind: input, shape index: {}]   ;;  %s5543_s6 = inlined_call_operand.hbm [shape: f32[2,128,128], index: 6, kind: output, shape index: {}]  }
   0x1   :  { %5679 = sst [smem:[#allocation100_spill]] %s5538_s1 }
   0x2   :  { %5680 = sst [smem:[#allocation101_spill]] %s5540_s3 }
   0x3   :  { %5681 = sst [smem:[#allocation102_spill]] %s5543_s6 }
   0x4   :  { %11 = vsyncpa [#allocation3], 0 }
   0x5   :  { %13 = vsyncpa [#allocation3 + $0x1], 0 }
   0x6   :  { %14 = vsyncpa [#allocation6], 0 }
   0x7   :  { %16 = vsyncpa [#allocation6 + $0x1], 0 }
   0x8   :  { %17 = vsyncpa [#allocation9], 0 }
   0x9   :  { %18 = vsyncpa [#allocation12], 0 }
   0xa   :  { %19 = vsyncpa [#allocation4], 0 }
   0xb   :  { %21 = vsyncpa [#allocation4 + $0x1], 0  ;;  %s3690_s21 = smov 0   ;;  %s3692_s22 = smov 0  }
   0xc   :  { %s3694_s23 = smov 0   ;;  %s3696_s24 = smov 0  }
   0xd LB: > { %5682 = sst [smem:[#allocation19_spill]] %s3627_s21  ;;  %s3711_s25 = sadd.s32 4294967295, %s3639_s24   ;;  %s3639_s24 = sphi %s3696_s24, %s5995_s24   ;;  %s3635_s23 = sphi %s3694_s23, %s5999_s23   ;;  %s3631_s22 = sphi %s3692_s22, %s5998_s22   ;;  %s3627_s21 = sphi %s3690_s21, %s5997_s21  }
   0xe   : > { %5683 = sst [smem:[#allocation20_spill]] %s3639_s24  ;;  %s2693_s26 = sadd.s32 4294967294, %s3639_s24  }
   0xf   : > { %s3715_s27 = sadd.s32 1, %s3639_s24   ;;  %s34_s28 = sadd.s32 1, %s3635_s23 }
  0x10   : > { %5684 = sst [smem:[#allocation21_spill]] %s3715_s27  ;;  %s31_s29 = ssub.s32 %s3639_s24, %s3715_s27 }
  0x11   : > { %p41_p0 = scmp.ne.s32.totalorder %s3635_s23, %s3631_s22  ;;  %p32_p1 = scmp.eq.s32.totalorder %s31_s29, 0 }
  0x12   : > { %p42_p2 = scmp.eq.s32.totalorder %s3639_s24, 0  ;;  %p47_p3 = scmp.ne.s32.totalorder %s3631_s22, %s3627_s21 }
  0x13   : > { %p5544_p4 = scmp.eq.s32.totalorder %s3711_s25, 0  ;;  %p186_p7 = scmp.eq.s32.totalorder %s3711_s25, 1 }
  0x14   : > { %s3727_s30 = scalar_select %p32_p1, %s3635_s23, %s34_s28  }
  0x15   : > { %p3729_p5 = por %p42_p2, %p41_p0  ;;  %p3735_p6 = por %p5544_p4, %p47_p3 }
  0x16   : > { %5685 = sst [smem:[#allocation22_spill]] %s3727_s30  ;;  %p192_p8 = scmp.eq.s32.totalorder %s2693_s26, 1 }
  0x17   : > { %s5686_s7 = scalar_select %p3729_p5, 1, 0 }
  0x18   : > { %s5687_s8 = scalar_select %p3735_p6, 1, 0 }
  0x19   : > { %p2694_p9 = scmp.ge.s32.totalorder %s3639_s24, 1  ;;  %p199_p10 = scmp.lt.s32.totalorder %s3639_s24, 3 }
  0x1a   : > { %p3742_p11 = por %p186_p7, %p41_p0  ;;  %p3746_p12 = por %p192_p8, %p47_p3 }
  0x1b   : > { %p3750_p13 = pnand %p2694_p9, %p199_p10  ;;  %s3641_s12 = smov [#allocation8]  }
  0x1c   : > { %s5688_s9 = scalar_select %p3742_p11, 1, 0 }
  0x1d   : > { %s5690_s10 = scalar_select %p3746_p12, 1, 0 }
  0x1e   : > { %5689 = sst [smem:[#allocation23_spill]] %s5688_s9  ;;  %p3049_p1 = pneg %p3750_p13 }
  0x1f   : > { %5691 = sst [smem:[#allocation24_spill]] %s5690_s10  ;;  %s211_s13 = sshll.u32 %s3641_s12, 4  ;;  %s212_s13 = int_to_ptr.vmem [resolvable:$true] %s211_s13 }
  0x20   : > { %s5692_s11 = scalar_select %p3750_p13, 1, 0 }
  0x21   : > { %p3758_p2 = pnand %p3049_p1, %p5544_p4  ;;  %s5694_s3 = sld [smem:[#allocation101_spill]] }
  0x23   : > { %s5693_s14 = scalar_select %p3758_p2, 1, 0 }
  0x24   : > { %p3772_p8 = pneg %p3758_p2 }
  0x26   : > { %s5695_s20 = scalar_select %p3772_p8, 1, 0 }
  0x27   : > { %s3387_s17 = scalar_lea.hbm %s5694_s3, 2048 }
  0x28   : > { %p3388_p7 = scmp.ne.s32.totalorder %s5694_s3, %s3387_s17  ;;  %p3394_p1 = scmp.lt.u32.totalorder %s3387_s17, %s5694_s3 }
  0x2a   : > { %p3390_p9 = pnand %p3772_p8, %p3388_p7 }
  0x2c   : > { %p3391_p10 = pneg %p3390_p9 }
  0x2e   : > { %p3396_p0 = pnand %p3394_p1, %p3391_p10 }
  0x30   : > { %3399 = shalt.err (!%p3396_p0)
}
  0x31   : > { %s3400_s29 = scalar_lea.vmem %s212_s13, 2048  ;;  %p3408_p11 = scmp.lt.s32.totalorder %s212_s13, %s212_s13 }
  0x32   : > { %p3401_p4 = scmp.ne.s32.totalorder %s212_s13, %s3400_s29  ;;  %p3409_p6 = scmp.lt.s32.totalorder %s3400_s29, %s3400_s29 }
  0x34   : > { %p3403_p3 = pnand %p3401_p4, %p3772_p8  ;;  %p3410_p13 = por %p3409_p6, %p3408_p11 }
  0x36   : > { %p3404_p12 = pneg %p3403_p3 }
  0x38   : > { %p3411_p5 = pnand %p3410_p13, %p3404_p12 }
  0x3a   : > { %3414 = shalt.err (!%p3411_p5)
}
  0x3b   : > { %s5551_s12 = smov 128   ;;  %s5552_s15 = smov 8  }
  0x3c   : > { %3052 = dma.hbm_to_vmem [thread:$0]  (!%p3758_p2), %s5694_s3, 2048, %s212_s13, [#allocation9], %s5551_s12, %s5551_s12, %s5552_s15  }
  0x3d   : > { %s5550_s18 = sand.u32 1, %s3635_s23   ;;  %s3793_s19 = sshll.u32 %s3639_s24, 10 }
  0x3e   : > { %s3797_s26 = sshll.u32 %s5550_s18, 6  ;;  %p5696_p4 = scmp.ne.s32.totalorder %s5686_s7, 0 }
  0x3f   : > { %p5697_p5 = scmp.lt.s32.totalorder %s3639_s24, 2  ;;  %s272_s29 = sand.u32 1, %s3639_s24  }
  0x40   : > { %s5699_s1 = sld [smem:[#allocation100_spill]]  ;;  %s276_s16 = scalar_lea.vmem [#allocation5], %s3797_s26 }
  0x41   : > { %p3803_p6 = pnand %p5697_p5, %p5696_p4  ;;  %s283_s17 = sshll.u32 %s276_s16, 4  ;;  %s3815_s17 = int_to_ptr.vmem [resolvable:$true] %s283_s17 }
  0x42   : > { %s3817_s7 = scalar_lea.sflag [#allocation6], %s272_s29 }
  0x43   : > { %s5698_s28 = scalar_select %p3803_p6, 1, 0 }
  0x44   : > { %p3823_p12 = pneg %p3803_p6 }
  0x46   : > { %s3812_s13 = scalar_lea.hbm %s5699_s1, %s3793_s19  ;;  %s3420_s15 = scalar_lea.hbm %s5699_s1, 2048 }
  0x47   : > { %s3415_s18 = scalar_lea.hbm %s3812_s13, 1024  ;;  %p3421_p3 = scmp.lt.u32.totalorder %s3812_s13, %s5699_s1 }
  0x48   : > { %p3416_p11 = scmp.ne.s32.totalorder %s3812_s13, %s3415_s18  ;;  %p3422_p7 = scmp.lt.u32.totalorder %s3420_s15, %s3415_s18 }
  0x49   : > { %s5700_s12 = scalar_select %p3823_p12, 1, 0 }
  0x4a   : > { %p3418_p13 = pnand %p3823_p12, %p3416_p11  ;;  %p3423_p9 = por %p3422_p7, %p3421_p3 }
  0x4b   : > { %p3424_p10 = scmp.lt.u32.totalorder %s3415_s18, %s3812_s13 }
  0x4c   : > { %p3419_p0 = pneg %p3418_p13 }
  0x4d   : > { %p3425_p1 = por %p3424_p10, %p3423_p9 }
  0x4f   : > { %p3426_p4 = pnand %p3425_p1, %p3419_p0 }
  0x51   : > { %3429 = shalt.err (!%p3426_p4)
}
  0x52   : > { %s3430_s29 = scalar_lea.vmem %s3815_s17, 1024  ;;  %s3644_s27 = smov [#allocation5]  }
  0x53   : > { %p3431_p5 = scmp.ne.s32.totalorder %s3815_s17, %s3430_s29  ;;  %s3435_s30 = sshll.u32 %s3644_s27, 4  ;;  %s3436_s30 = int_to_ptr.vmem [resolvable:$false] %s3435_s30 }
  0x54   : > { %s3437_s3 = scalar_lea.vmem %s3436_s30, 2048  ;;  %p3438_p2 = scmp.lt.s32.totalorder %s3815_s17, %s3436_s30 }
  0x55   : > { %p3433_p11 = pnand %p3431_p5, %p3823_p12  ;;  %p3439_p8 = scmp.lt.s32.totalorder %s3437_s3, %s3430_s29 }
  0x57   : > { %p3434_p13 = pneg %p3433_p11  ;;  %p3440_p3 = por %p3439_p8, %p3438_p2 }
  0x59   : > { %p3441_p7 = pnand %p3440_p3, %p3434_p13 }
  0x5b   : > { %3444 = shalt.err (!%p3441_p7)
}
  0x5c   : > { %s3645_s15 = smov 64   ;;  %s3646_s18 = smov 4  }
  0x5d   : > { %3065 = dma.hbm_to_vmem [thread:$0]  (!%p3803_p6), %s3812_s13, 1024, %s3815_s17, %s3817_s7, %s3645_s15, %s3645_s15, %s3646_s18  }
  0x5e   : > { %s3647_s16 = smov [#allocation10]   ;;  %s3648_s30 = smov [#allocation11]  }
  0x5f   : > { %s224_s27 = sshll.u32 %s3647_s16, 4  ;;  %s237_s29 = sshll.u32 %s3648_s30, 4  ;;  %s225_s27 = int_to_ptr.vmem [resolvable:$true] %s224_s27  ;;  %s238_s29 = int_to_ptr.vmem [resolvable:$true] %s237_s29 }
  0x60   : > { %s3445_s24 = scalar_lea.hbm %s5541_s4, 2048  ;;  %p5701_p8 = scmp.ne.s32.totalorder %s5695_s20, 0 }
  0x61   : > { %p3446_p2 = scmp.ne.s32.totalorder %s5541_s4, %s3445_s24  ;;  %p3452_p10 = scmp.lt.u32.totalorder %s3445_s24, %s5541_s4 }
  0x63   : > { %p3448_p0 = pnand %p3446_p2, %p5701_p8 }
  0x65   : > { %p3449_p9 = pneg %p3448_p0 }
  0x67   : > { %p3454_p1 = pnand %p3452_p10, %p3449_p9 }
  0x69   : > { %3457 = shalt.err (!%p3454_p1)
}
  0x6a   : > { %s3458_s13 = scalar_lea.vmem %s225_s27, 2048  ;;  %p3466_p13 = scmp.lt.s32.totalorder %s225_s27, %s225_s27 }
  0x6b   : > { %p3459_p4 = scmp.ne.s32.totalorder %s225_s27, %s3458_s13  ;;  %p3467_p3 = scmp.lt.s32.totalorder %s3458_s13, %s3458_s13 }
  0x6d   : > { %p3461_p5 = pnand %p3459_p4, %p5701_p8  ;;  %p3468_p7 = por %p3467_p3, %p3466_p13 }
  0x6f   : > { %p3462_p11 = pneg %p3461_p5 }
  0x71   : > { %p3469_p6 = pnand %p3468_p7, %p3462_p11 }
  0x73   : > { %3472 = shalt.err (!%p3469_p6)
}
  0x74   : > { %p5702_p2 = scmp.ne.s32.totalorder %s5693_s14, 0  ;;  %s5703_s1 = smov 8  }
  0x75   : > { %s5704_s21 = smov 128   ;;  %s3473_s17 = scalar_lea.hbm %s5542_s5, 2048 }
  0x76   : > { %3055 = dma.hbm_to_vmem [thread:$0]  (!%p5702_p2), %s5541_s4, 2048, %s225_s27, [#allocation9], %s5704_s21, %s5704_s21, %s5703_s1  }
  0x77   : > { %p3474_p0 = scmp.ne.s32.totalorder %s5542_s5, %s3473_s17  ;;  %p3480_p10 = scmp.lt.u32.totalorder %s3473_s17, %s5542_s5 }
  0x79   : > { %p3476_p6 = pnand %p3474_p0, %p5701_p8 }
  0x7b   : > { %p3477_p9 = pneg %p3476_p6 }
  0x7d   : > { %p3482_p1 = pnand %p3480_p10, %p3477_p9 }
  0x7f   : > { %3485 = shalt.err (!%p3482_p1)
}
  0x80   : > { %s3486_s6 = scalar_lea.vmem %s238_s29, 2048  ;;  %p3494_p13 = scmp.lt.s32.totalorder %s238_s29, %s238_s29 }
  0x81   : > { %p3487_p4 = scmp.ne.s32.totalorder %s238_s29, %s3486_s6  ;;  %p3495_p3 = scmp.lt.s32.totalorder %s3486_s6, %s3486_s6 }
  0x83   : > { %p3489_p5 = pnand %p3487_p4, %p5701_p8  ;;  %p3496_p7 = por %p3495_p3, %p3494_p13 }
  0x85   : > { %p3490_p11 = pneg %p3489_p5 }
  0x87   : > { %p3497_p12 = pnand %p3496_p7, %p3490_p11 }
  0x89   : > { %3500 = shalt.err (!%p3497_p12)
}
  0x8a   : > { %3058 = dma.hbm_to_vmem [thread:$0]  (!%p5702_p2), %s5542_s5, 2048, %s238_s29, [#allocation12], %s3645_s15, %s3645_s15, %s3646_s18  }
  0x8b   : > { %s3896_s24 = scalar_lea.hbm %s5537_s0, %s3793_s19  ;;  %s255_s14 = scalar_lea.vmem [#allocation2], %s3797_s26 }
  0x8c   : > { %s262_s9 = sshll.u32 %s255_s14, 4  ;;  %s3905_s16 = scalar_lea.hbm %s5539_s2, %s3793_s19  ;;  %s3899_s9 = int_to_ptr.vmem [resolvable:$true] %s262_s9 }
  0x8d   : > { %s5705_s30 = sand.u32 1, %s3635_s23   ;;  %s3501_s3 = scalar_lea.hbm %s3896_s24, 1024 }
  0x8e   : > { %s3909_s29 = scalar_lea.sflag [#allocation3], %s5705_s30  ;;  %p3502_p12 = scmp.ne.s32.totalorder %s3896_s24, %s3501_s3 }
  0x8f   : > { %p5706_p8 = scmp.ne.s32.totalorder %s5700_s12, 0  ;;  %s3506_s27 = scalar_lea.hbm %s5537_s0, 2048 }
  0x90   : > { %p3507_p6 = scmp.lt.u32.totalorder %s3896_s24, %s5537_s0  ;;  %p3508_p9 = scmp.lt.u32.totalorder %s3506_s27, %s3501_s3 }
  0x91   : > { %p3504_p2 = pnand %p3502_p12, %p5706_p8  ;;  %p3510_p1 = scmp.lt.u32.totalorder %s3501_s3, %s3896_s24 }
  0x92   : > { %p3509_p10 = por %p3508_p9, %p3507_p6 }
  0x93   : > { %p3505_p0 = pneg %p3504_p2 }
  0x94   : > { %p3511_p4 = por %p3510_p1, %p3509_p10 }
  0x96   : > { %p3512_p5 = pnand %p3511_p4, %p3505_p0 }
  0x98   : > { %3515 = shalt.err (!%p3512_p5)
}
  0x99   : > { %s3516_s19 = scalar_lea.vmem %s3899_s9, 1024  ;;  %s3649_s21 = smov [#allocation2]  }
  0x9a   : > { %p3517_p11 = scmp.ne.s32.totalorder %s3899_s9, %s3516_s19  ;;  %s3521_s14 = sshll.u32 %s3649_s21, 4  ;;  %s3522_s14 = int_to_ptr.vmem [resolvable:$false] %s3521_s14 }
  0x9b   : > { %s3523_s10 = scalar_lea.vmem %s3522_s14, 2048  ;;  %p3524_p7 = scmp.lt.s32.totalorder %s3899_s9, %s3522_s14 }
  0x9c   : > { %p3519_p13 = pnand %p3517_p11, %p5706_p8  ;;  %p3525_p12 = scmp.lt.s32.totalorder %s3523_s10, %s3516_s19 }
  0x9e   : > { %p3520_p3 = pneg %p3519_p13  ;;  %p3526_p2 = por %p3525_p12, %p3524_p7 }
  0xa0   : > { %p3527_p6 = pnand %p3526_p2, %p3520_p3 }
  0xa2   : > { %3530 = shalt.err (!%p3527_p6)
}
  0xa3   : > { %p5707_p0 = scmp.ne.s32.totalorder %s5698_s28, 0  ;;  %s297_s17 = scalar_lea.vmem [#allocation7], %s3797_s26 }
  0xa4   : > { %s304_s30 = sshll.u32 %s297_s17, 4  ;;  %s3531_s3 = scalar_lea.hbm %s3905_s16, 1024  ;;  %s3937_s30 = int_to_ptr.vmem [resolvable:$true] %s304_s30 }
  0xa5   : > { %3062 = dma.hbm_to_vmem [thread:$0]  (!%p5707_p0), %s3896_s24, 1024, %s3899_s9, %s3909_s29, %s3645_s15, %s3645_s15, %s3646_s18  }
  0xa6   : > { %p3532_p9 = scmp.ne.s32.totalorder %s3905_s16, %s3531_s3  ;;  %s3536_s27 = scalar_lea.hbm %s5539_s2, 2048 }
  0xa7   : > { %p3537_p4 = scmp.lt.u32.totalorder %s3905_s16, %s5539_s2  ;;  %p3538_p5 = scmp.lt.u32.totalorder %s3536_s27, %s3531_s3 }
  0xa8   : > { %p3534_p10 = pnand %p3532_p9, %p5706_p8  ;;  %p3540_p13 = scmp.lt.u32.totalorder %s3531_s3, %s3905_s16 }
  0xa9   : > { %p3539_p11 = por %p3538_p5, %p3537_p4 }
  0xaa   : > { %p3535_p1 = pneg %p3534_p10 }
  0xab   : > { %p3541_p3 = por %p3540_p13, %p3539_p11 }
  0xad   : > { %p3542_p7 = pnand %p3541_p3, %p3535_p1 }
  0xaf   : > { %3545 = shalt.err (!%p3542_p7)
}
  0xb0   : > { %s3546_s26 = scalar_lea.vmem %s3937_s30, 1024  ;;  %s3650_s24 = smov [#allocation7]  }
  0xb1   : > { %p3547_p12 = scmp.ne.s32.totalorder %s3937_s30, %s3546_s26  ;;  %s3551_s9 = sshll.u32 %s3650_s24, 4  ;;  %s3552_s9 = int_to_ptr.vmem [resolvable:$false] %s3551_s9 }
  0xb2   : > { %s3553_s29 = scalar_lea.vmem %s3552_s9, 2048  ;;  %p3554_p9 = scmp.lt.s32.totalorder %s3937_s30, %s3552_s9 }
  0xb3   : > { %p3549_p2 = pnand %p3547_p12, %p5706_p8  ;;  %p3555_p10 = scmp.lt.s32.totalorder %s3553_s29, %s3546_s26 }
  0xb5   : > { %p3550_p6 = pneg %p3549_p2  ;;  %p3556_p4 = por %p3555_p10, %p3554_p9 }
  0xb7   : > { %p3557_p5 = pnand %p3556_p4, %p3550_p6 }
  0xb9   : > { %3560 = shalt.err (!%p3557_p5)
}
  0xba   : > { %3068 = dma.hbm_to_vmem [thread:$0]  (!%p5707_p0), %s3905_s16, 1024, %s3937_s30, %s3817_s7, %s3645_s15, %s3645_s15, %s3646_s18  }
  0xbb   : > { %p5708_p8 = scmp.ne.s32.totalorder %s5692_s11, 0 }
  0xbd   : > { %316 = sbr.rel (%p5708_p8) target bundleno = 1412 (0x584), region = 44 }
  0xc4   : > { %s3967_s12 = sand.u32 1, %s3631_s22   ;;  %p5709_p1 = scmp.ne.s32.totalorder %s5687_s8, 0 }
  0xc5   : > { %s2709_s19 = sshll.u32 %s3967_s12, 6  ;;  %s319_s21 = scalar_lea.sflag [#allocation3], %s3967_s12 }
  0xc6   : > { %s3971_s14 = scalar_lea.vmem [#allocation2], %s2709_s19 }
  0xc7   : > { %3606 = dma.done.wait (%p5709_p1), %s319_s21, 1024  }
  0xc8   : > { %3608 = vsyncadd (%p5709_p1), %s319_s21, 4294966272  ;;  %s327_s28 = sand.u32 1, %s3711_s25   ;;  %s3978_s7 = scalar_lea.vmem [#allocation5], %s2709_s19 }
  0xc9   : > { %s328_s11 = scalar_lea.sflag [#allocation6], %s327_s28 }
  0xca   : > { %3610 = dma.done.wait (%p5709_p1), %s328_s11, 2048  }
  0xcb   : > { %3612 = vsyncadd (%p5709_p1), %s328_s11, 4294965248  ;;  %s3984_s15 = scalar_lea.vmem [#allocation7], %s2709_s19  ;;  %p5710_p0 = scmp.eq.s32.totalorder %s3711_s25, 0 }
  0xcd   : > { %3614 = dma.done.wait (%p5710_p0), [#allocation9], 4096   ;;  %p5711_p11 = pmov %p5710_p0 }
  0xce   : > { %p5712_p13 = pmov %p5710_p0 }
  0xcf   : > { %3616 = vsyncadd (%p5711_p11), [#allocation9], 4294963200 }
  0xd0   : > { %3618 = dma.done.wait (%p5712_p13), [#allocation12], 2048   ;;  %p5713_p3 = pmov %p5710_p0 }
  0xd1   : > { %v3651_v0 = vmov 0   ;;  %v3123_v1 = vld [vmem:[#allocation8 + $0x4] ss:$8 sps:$4 sm:$0xff]   ;;  %v3996_v2 = vld [vmem:[#allocation8] ss:$8 sps:$4 sm:$0xff]   ;;  %s2715_s8 = sshll.u32 %s3967_s12, 7 }
  0xd2   : > { %3620 = vsyncadd (%p5713_p3), [#allocation12], 4294965248  ;;  %664 = vmatprep.mubr.bf16.mxu0 %v3651_v0  ;;  %704 = vmatprep.mubr.bf16.mxu1 %v3651_v0  ;;  %v3998_v3 = vld [vmem:[#allocation8 + $0x14] ss:$8 sps:$4 sm:$0xff]   ;;  %v4002_v4 = vld [vmem:[#allocation8 + $0x10] ss:$8 sps:$4 sm:$0xff]  }
  0xd3   : > { %632 = vmatprep.subr.bf16.mxu0 %v3123_v1  ;;  %3013 = vmatprep.subr.bf16.mxu1 %v3123_v1  ;;  %v4006_v5 = vld [vmem:[#allocation8 + $0x24] ss:$8 sps:$4 sm:$0xff]   ;;  %v4010_v6 = vld [vmem:[#allocation8 + $0x20] ss:$8 sps:$4 sm:$0xff]   ;;  %v4014_v7 = vld [vmem:[#allocation8 + $0x34] ss:$8 sps:$4 sm:$0xff]  }
  0xd4   : > { %633 = vmatpush1.bf16.msra.mxu0 %v3996_v2  ;;  %3021 = vmatpush1.bf16.msra.mxu1 %v3996_v2  ;;  %v4018_v8 = vld [vmem:[#allocation8 + $0x30] ss:$8 sps:$4 sm:$0xff]   ;;  %v4022_v9 = vld [vmem:[#allocation8 + $0x44] ss:$8 sps:$4 sm:$0xff]   ;;  %v4026_v10 = vld [vmem:[#allocation8 + $0x40] ss:$8 sps:$4 sm:$0xff]  }
  0xd5   : > { %634 = vmatprep.subr.bf16.mxu0 %v3998_v3  ;;  %3014 = vmatprep.subr.bf16.mxu1 %v3998_v3  ;;  %v4030_v11 = vld [vmem:[#allocation8 + $0x54] ss:$8 sps:$4 sm:$0xff]   ;;  %v4034_v12 = vld [vmem:[#allocation8 + $0x50] ss:$8 sps:$4 sm:$0xff]   ;;  %v4038_v13 = vld [vmem:[#allocation8 + $0x64] ss:$8 sps:$4 sm:$0xff]  }
  0xd6   : > { %v4042_v14 = vld [vmem:[#allocation8 + $0x60] ss:$8 sps:$4 sm:$0xff]   ;;  %v4046_v15 = vld [vmem:[#allocation8 + $0x74] ss:$8 sps:$4 sm:$0xff]   ;;  %v4048_v16 = vld [vmem:[#allocation8 + $0x70] ss:$8 sps:$4 sm:$0xff]  }
  0xd7   : > { %v4051_v17 = vld [vmem:[%s3971_s14] sm:$0xf]  ;;  %v4056_v18 = vld [vmem:[%s3971_s14 + $0x4] sm:$0xf]  ;;  %v4076_v25 = vld [vmem:[#allocation10 + $0x14] ss:$8 sps:$4 sm:$0xff]  }
  0xd8   : > { %635 = vmatpush1.bf16.msra.mxu0 %v4002_v4  ;;  %3022 = vmatpush1.bf16.msra.mxu1 %v4002_v4  ;;  %v4059_v19 = vld [vmem:[%s3971_s14 + $0x20] sm:$0xf]  ;;  %v4062_v20 = vld [vmem:[%s3971_s14 + $0x24] sm:$0xf]  ;;  %v2716_v22 = vcombine.low %v4051_v17, %v4056_v18  ;;  %v4079_v26 = vld [vmem:[#allocation10 + $0x10] ss:$8 sps:$4 sm:$0xff]   ;;  %v906_v56 = vmul.bf16 %v4051_v17, %v4051_v17  ;;  %v907_v57 = vmul.bf16 %v4056_v18, %v4056_v18 }
  0xd9   : > { %636 = vmatprep.subr.bf16.mxu0 %v4006_v5  ;;  %3015 = vmatprep.subr.bf16.mxu1 %v4006_v5  ;;  %v4066_v21 = vld [vmem:[#allocation10 + $0x4] ss:$8 sps:$4 sm:$0xff]   ;;  %v2720_v23 = vcombine.low %v4059_v19, %v4062_v20  ;;  %v4074_v24 = vld [vmem:[#allocation10] ss:$8 sps:$4 sm:$0xff]   ;;  %v4111_v35 = vld [vmem:[#allocation10 + $0x34] ss:$8 sps:$4 sm:$0xff]   ;;  %v914_v18 = vmul.bf16 %v4059_v19, %v4059_v19 }
  0xda   : > { %v4082_v27 = vld [vmem:[%s3971_s14 + $0x8] sm:$0xf]  ;;  %v4085_v28 = vld [vmem:[%s3971_s14 + $0xc] sm:$0xf]  ;;  %v4113_v36 = vld [vmem:[#allocation10 + $0x30] ss:$8 sps:$4 sm:$0xff]   ;;  %v2748_v61 = vcombine.low %v906_v56, %v907_v57 }
  0xdb   : > { %v4088_v29 = vld [vmem:[%s3971_s14 + $0x28] sm:$0xf]  ;;  %v4091_v30 = vld [vmem:[%s3971_s14 + $0x2c] sm:$0xf]  ;;  %v2717_v32 = vcombine.low %v4082_v27, %v4085_v28  ;;  %v4116_v37 = vld [vmem:[%s3971_s14 + $0x10] sm:$0xf]  ;;  %v908_v63 = vmul.bf16 %v4082_v27, %v4082_v27 }
  0xdc   : > { %637 = vmatpush1.bf16.msra.mxu0 %v4010_v6  ;;  %3023 = vmatpush1.bf16.msra.mxu1 %v4010_v6  ;;  %v4093_v31 = vld [vmem:[#allocation10 + $0x24] ss:$8 sps:$4 sm:$0xff]   ;;  %v2721_v33 = vcombine.low %v4088_v29, %v4091_v30  ;;  %v4107_v34 = vld [vmem:[#allocation10 + $0x20] ss:$8 sps:$4 sm:$0xff]   ;;  %v4121_v38 = vld [vmem:[%s3971_s14 + $0x14] sm:$0xf]  ;;  %v916_v19 = vmul.bf16 %v4088_v29, %v4088_v29 }
  0xdd   : > { %638 = vmatprep.subr.bf16.mxu0 %v4014_v7  ;;  %3016 = vmatprep.subr.bf16.mxu1 %v4014_v7  ;;  %v4124_v39 = vld [vmem:[%s3971_s14 + $0x30] sm:$0xf]  ;;  %v4127_v40 = vld [vmem:[%s3971_s14 + $0x34] sm:$0xf]  ;;  %v4131_v41 = vld [vmem:[#allocation10 + $0x44] ss:$8 sps:$4 sm:$0xff]   ;;  %v2718_v42 = vcombine.low %v4116_v37, %v4121_v38 }
  0xde   : > { %v2722_v43 = vcombine.low %v4124_v39, %v4127_v40  ;;  %v4141_v44 = vld [vmem:[#allocation10 + $0x40] ss:$8 sps:$4 sm:$0xff]   ;;  %v4145_v45 = vld [vmem:[#allocation10 + $0x54] ss:$8 sps:$4 sm:$0xff]   ;;  %v4147_v46 = vld [vmem:[#allocation10 + $0x50] ss:$8 sps:$4 sm:$0xff]   ;;  %v919_v29 = vmul.bf16 %v4127_v40, %v4127_v40 }
  0xdf   : > { %v4150_v47 = vld [vmem:[%s3971_s14 + $0x18] sm:$0xf]  ;;  %v4155_v48 = vld [vmem:[%s3971_s14 + $0x1c] sm:$0xf]  ;;  %v4165_v51 = vld [vmem:[#allocation10 + $0x64] ss:$8 sps:$4 sm:$0xff]  }
  0xe0   : > { %639 = vmatpush1.bf16.msra.mxu0 %v4018_v8  ;;  %3024 = vmatpush1.bf16.msra.mxu1 %v4018_v8  ;;  %v4158_v49 = vld [vmem:[%s3971_s14 + $0x38] sm:$0xf]  ;;  %v4161_v50 = vld [vmem:[%s3971_s14 + $0x3c] sm:$0xf]  ;;  %v2719_v52 = vcombine.low %v4150_v47, %v4155_v48  ;;  %v4175_v54 = vld [vmem:[#allocation10 + $0x60] ss:$8 sps:$4 sm:$0xff]  }
  0xe1   : > { %640 = vmatprep.subr.bf16.mxu0 %v4022_v9  ;;  %3017 = vmatprep.subr.bf16.mxu1 %v4022_v9  ;;  %v2723_v53 = vcombine.low %v4158_v49, %v4161_v50  ;;  %v4179_v55 = vld [vmem:[#allocation10 + $0x74] ss:$8 sps:$4 sm:$0xff]   ;;  %v4187_v58 = vld [vmem:[#allocation10 + $0x70] ss:$8 sps:$4 sm:$0xff]   ;;  %v4190_v59 = vld [vmem:[%s3978_s7] sm:$0xf] }
  0xe2   : > { %v4193_v60 = vld [vmem:[%s3978_s7 + $0x4] sm:$0xf]  ;;  %v419_v27 = vld [vmem:[%s3978_s7 + $0x2c] sm:$0xf]  ;;  %s5460_s18 = scalar_lea.vmem [#allocation13], %s2715_s8  ;;  %s5987_s16 = sld [smem:[#allocation23_spill]] }
  0xe3   : > { %v2740_v62 = vcombine.low %v4190_v59, %v4193_v60  ;;  %s2812_s10 = sshll.u32 %s3711_s25, 11  ;;  %s2548_s17 = sshll.u32 %s5460_s18, 4  ;;  %s5491_s17 = int_to_ptr.vmem [resolvable:$true] %s2548_s17 }
  0xe4   : > { %641 = vmatpush1.bf16.msra.mxu0 %v4026_v10  ;;  %3025 = vmatpush1.bf16.msra.mxu1 %v4026_v10  ;;  %s5988_s13 = sld [smem:[#allocation102_spill]]  ;;  %s2535_s25 = scalar_lea.sflag [#allocation4], %s3967_s12 }
  0xe5   : > { %642 = vmatprep.subr.bf16.mxu0 %v4030_v11  ;;  %3018 = vmatprep.subr.bf16.mxu1 %v4030_v11  ;;  %s3561_s27 = scalar_lea.vmem %s5491_s17, 2048  ;;  %s3652_s1 = smov [#allocation13]  }
  0xe6   : > { %p3562_p7 = scmp.ne.s32.totalorder %s5491_s17, %s3561_s27  ;;  %s3565_s20 = sshll.u32 %s3652_s1, 4  ;;  %s3566_s20 = int_to_ptr.vmem [resolvable:$false] %s3565_s20 }
  0xe7   : > { %s3567_s26 = scalar_lea.vmem %s3566_s20, 4096  ;;  %p3568_p9 = scmp.lt.s32.totalorder %s5491_s17, %s3566_s20 }
  0xe8   : > { %643 = vmatpush1.bf16.msra.mxu0 %v4034_v12  ;;  %3026 = vmatpush1.bf16.msra.mxu1 %v4034_v12  ;;  %p5989_p12 = scmp.ne.s32.totalorder %s5987_s16, 0  ;;  %p3569_p10 = scmp.lt.s32.totalorder %s3567_s26, %s3561_s27 }
  0xe9   : > { %644 = vmatprep.subr.bf16.mxu0 %v4038_v13  ;;  %3019 = vmatprep.subr.bf16.mxu1 %v4038_v13 }
  0xea   : > { %s5489_s6 = scalar_lea.hbm %s5988_s13, %s2812_s10  ;;  %p3563_p2 = pnand %p3562_p7, %p5989_p12 }
  0xeb   : > { %p3570_p4 = por %p3569_p10, %p3568_p9 }
  0xec   : > { %645 = vmatpush1.bf16.msra.mxu0 %v4042_v14  ;;  %3027 = vmatpush1.bf16.msra.mxu1 %v4042_v14  ;;  %p3564_p6 = pneg %p3563_p2 }
  0xed   : > { %646 = vmatprep.subr.bf16.mxu0 %v4046_v15  ;;  %3020 = vmatprep.subr.bf16.mxu1 %v4046_v15 }
  0xee   : > { %p3571_p5 = pnand %p3570_p4, %p3564_p6 }
  0xf0   : > { %647 = vmatpush1.bf16.msra.mxu0 %v4048_v16  ;;  %3028 = vmatpush1.bf16.msra.mxu1 %v4048_v16 }
  0xf1   : > { %793 = vmatprep.subr.bf16.mxu1 %v3123_v1  ;;  %1050 = vmatprep.subr.bf16.mxu0 %v4066_v21  ;;  %v909_v1 = vmul.bf16 %v4085_v28, %v4085_v28 }
  0xf3   : > { %665 = vmatmul.mubr.bf16.vlgmr.msra.gmra.mrb[0].mxu0 %v2716_v22  ;;  %705 = vmatmul.mubr.bf16.vlgmr.msra.gmra.mrb[0].mxu1 %v2720_v23  ;;  %v4265_v22 = vld [vmem:[%s3978_s7 + $0x20] sm:$0xf]  ;;  %v417_v23 = vld [vmem:[%s3978_s7 + $0x24] sm:$0xf] }
  0xf4   : > { %794 = vmatpush1.bf16.msra.mxu1 %v3996_v2  ;;  %1051 = vmatpush1.bf16.msra.mxu0 %v4074_v24  ;;  %v4211_v2 = vld [vmem:[%s3978_s7 + $0x8] sm:$0xf] }
  0xf5   : > { %795 = vmatprep.subr.bf16.mxu1 %v3998_v3  ;;  %1052 = vmatprep.subr.bf16.mxu0 %v4076_v25  ;;  %v4214_v3 = vld [vmem:[%s3978_s7 + $0xc] sm:$0xf] }
  0xf6   : > { %674 = vmatprep.mubr.bf16.mxu0 %v3651_v0  ;;  %714 = vmatprep.mubr.bf16.mxu1 %v3651_v0 }
  0xf8   : > { %796 = vmatpush1.bf16.msra.mxu1 %v4002_v4  ;;  %1053 = vmatpush1.bf16.msra.mxu0 %v4079_v26  ;;  %v2741_v4 = vcombine.low %v4211_v2, %v4214_v3 }
  0xf9   : > { %797 = vmatprep.subr.bf16.mxu1 %v4006_v5  ;;  %1054 = vmatprep.subr.bf16.mxu0 %v4093_v31  ;;  %v2749_v5 = vcombine.low %v908_v63, %v909_v1 }
  0xfb   : > { %675 = vmatmul.mubr.bf16.gmra.mrb[4].mxu0 %v2717_v32  ;;  %715 = vmatmul.mubr.bf16.gmra.mrb[4].mxu1 %v2721_v33  ;;  %v918_v32 = vmul.bf16 %v4124_v39, %v4124_v39  ;;  %v421_v33 = vld [vmem:[%s3978_s7 + $0x34] sm:$0xf]  ;;  %v423_v39 = vld [vmem:[%s3978_s7 + $0x3c] sm:$0xf] }
  0xfc   : > { %798 = vmatpush1.bf16.msra.mxu1 %v4010_v6  ;;  %1055 = vmatpush1.bf16.msra.mxu0 %v4107_v34  ;;  %v910_v6 = vmul.bf16 %v4116_v37, %v4116_v37  ;;  %v921_v37 = vmul.bf16 %v4161_v50, %v4161_v50  ;;  %v1178_v1 = vmul.bf16 %v423_v39, %v423_v39 }
  0xfd   : > { %799 = vmatprep.subr.bf16.mxu1 %v4014_v7  ;;  %1056 = vmatprep.subr.bf16.mxu0 %v4111_v35  ;;  %v911_v7 = vmul.bf16 %v4121_v38, %v4121_v38  ;;  %v422_v38 = vld [vmem:[%s3978_s7 + $0x38] sm:$0xf] }
  0xfe   : > { %684 = vmatprep.mubr.bf16.mxu0 %v3651_v0  ;;  %724 = vmatprep.mubr.bf16.mxu1 %v3651_v0  ;;  %v2747_v40 = vcombine.low %v422_v38, %v423_v39  ;;  %v1177_v63 = vmul.bf16 %v422_v38, %v422_v38 }
 0x100   : > { %800 = vmatpush1.bf16.msra.mxu1 %v4018_v8  ;;  %1057 = vmatpush1.bf16.msra.mxu0 %v4113_v36  ;;  %v4229_v8 = vld [vmem:[%s3978_s7 + $0x10] sm:$0xf] }
 0x101   : > { %801 = vmatprep.subr.bf16.mxu1 %v4022_v9  ;;  %1058 = vmatprep.subr.bf16.mxu0 %v4131_v41  ;;  %v4232_v9 = vld [vmem:[%s3978_s7 + $0x14] sm:$0xf] }
 0x103   : > { %685 = vmatmul.mubr.bf16.gmra.mrb[8].mxu0 %v2718_v42  ;;  %725 = vmatmul.mubr.bf16.gmra.mrb[8].mxu1 %v2722_v43  ;;  %v1163_v42 = vmul.bf16 %v4190_v59, %v4190_v59  ;;  %v1164_v43 = vmul.bf16 %v4193_v60, %v4193_v60 }
 0x104   : > { %802 = vmatpush1.bf16.msra.mxu1 %v4026_v10  ;;  %1059 = vmatpush1.bf16.msra.mxu0 %v4141_v44  ;;  %v2742_v10 = vcombine.low %v4229_v8, %v4232_v9 }
 0x105   : > { %803 = vmatprep.subr.bf16.mxu1 %v4030_v11  ;;  %1060 = vmatprep.subr.bf16.mxu0 %v4145_v45  ;;  %v2750_v11 = vcombine.low %v910_v6, %v911_v7 }
 0x106   : > { %694 = vmatprep.mubr.bf16.mxu0 %v3651_v0  ;;  %734 = vmatprep.mubr.bf16.mxu1 %v3651_v0 }
 0x108   : > { %804 = vmatpush1.bf16.msra.mxu1 %v4034_v12  ;;  %1061 = vmatpush1.bf16.msra.mxu0 %v4147_v46  ;;  %v912_v12 = vmul.bf16 %v4150_v47, %v4150_v47 }
 0x109   : > { %805 = vmatprep.subr.bf16.mxu1 %v4038_v13  ;;  %1062 = vmatprep.subr.bf16.mxu0 %v4165_v51  ;;  %v913_v13 = vmul.bf16 %v4155_v48, %v4155_v48  ;;  %v1167_v48 = vmul.bf16 %v4229_v8, %v4229_v8 }
 0x10b   : > { %695 = vmatmul.mubr.bf16.gmra.mrb[12].mxu0 %v2719_v52  ;;  %735 = vmatmul.mubr.bf16.gmra.mrb[12].mxu1 %v2723_v53  ;;  %v2751_v17 = vcombine.low %v912_v12, %v913_v13 }
 0x10c   : > { %806 = vmatpush1.bf16.msra.mxu1 %v4042_v14  ;;  %1063 = vmatpush1.bf16.msra.mxu0 %v4175_v54  ;;  %v4247_v14 = vld [vmem:[%s3978_s7 + $0x18] sm:$0xf] }
 0x10d   : > { %807 = vmatprep.subr.bf16.mxu1 %v4046_v15  ;;  %1064 = vmatprep.subr.bf16.mxu0 %v4179_v55  ;;  %v4250_v15 = vld [vmem:[%s3978_s7 + $0x1c] sm:$0xf] }
 0x10e   : > { %825 = vmatprep.mubr.bf16.mxu1 %v3651_v0  ;;  %1082 = vmatprep.mubr.bf16.mxu0 %v3651_v0  ;;  %v1170_v52 = vmul.bf16 %v4250_v15, %v4250_v15 }
 0x110   : > { %808 = vmatpush1.bf16.msra.mxu1 %v4048_v16  ;;  %1065 = vmatpush1.bf16.msra.mxu0 %v4187_v58  ;;  %v2743_v16 = vcombine.low %v4247_v14, %v4250_v15 }
 0x111   : > { %1227 = vmatprep.subr.bf16.mxu1 %v4066_v21  ;;  %v915_v21 = vmul.bf16 %v4062_v20, %v4062_v20  ;;  %v917_v20 = vmul.bf16 %v4091_v30, %v4091_v30  ;;  %v420_v30 = vld [vmem:[%s3978_s7 + $0x30] sm:$0xf] }
 0x112   : > { %v1175_v60 = vmul.bf16 %v420_v30, %v420_v30 }
 0x113   : > { %826 = vmatmul.mubr.bf16.vlgmr.msra.gmra.mrb[16].mxu1 %v2740_v62  ;;  %1083 = vmatmul.mubr.bf16.vlgmr.msra.gmra.mrb[16].mxu0 %v2748_v61  ;;  %v1176_v61 = vmul.bf16 %v421_v33, %v421_v33 }
 0x114   : > { %835 = vmatprep.mubr.bf16.mxu1 %v3651_v0  ;;  %1092 = vmatprep.mubr.bf16.mxu0 %v3651_v0 }
 0x115   : > { %1228 = vmatpush1.bf16.msra.mxu1 %v4074_v24  ;;  %v2744_v24 = vcombine.low %v4265_v22, %v417_v23  ;;  %v2778_v62 = vcombine.low %v1175_v60, %v1176_v61 }
 0x116   : > { %1229 = vmatprep.subr.bf16.mxu1 %v4076_v25  ;;  %v2752_v25 = vcombine.low %v914_v18, %v915_v21 }
 0x119   : > { %1230 = vmatpush1.bf16.msra.mxu1 %v4079_v26  ;;  %v418_v26 = vld [vmem:[%s3978_s7 + $0x28] sm:$0xf] }
 0x11a   : > { %1231 = vmatprep.subr.bf16.mxu1 %v4093_v31  ;;  %v2745_v28 = vcombine.low %v418_v26, %v419_v27  ;;  %v2753_v31 = vcombine.low %v916_v19, %v917_v20  ;;  %v1173_v57 = vmul.bf16 %v418_v26, %v418_v26 }
 0x11b   : > { %836 = vmatmul.mubr.bf16.gmra.mrb[20].mxu1 %v2741_v4  ;;  %1093 = vmatmul.mubr.bf16.gmra.mrb[20].mxu0 %v2749_v5 }
 0x11c   : > { %845 = vmatprep.mubr.bf16.mxu1 %v3651_v0  ;;  %1102 = vmatprep.mubr.bf16.mxu0 %v3651_v0 }
 0x11d   : > { %1232 = vmatpush1.bf16.msra.mxu1 %v4107_v34  ;;  %v2746_v34 = vcombine.low %v420_v30, %v421_v33 }
 0x11e   : > { %1233 = vmatprep.subr.bf16.mxu1 %v4111_v35  ;;  %v2754_v35 = vcombine.low %v918_v32, %v919_v29 }
 0x121   : > { %1234 = vmatpush1.bf16.msra.mxu1 %v4113_v36  ;;  %v920_v36 = vmul.bf16 %v4158_v49, %v4158_v49  ;;  %v1168_v49 = vmul.bf16 %v4232_v9, %v4232_v9 }
 0x122   : > { %1235 = vmatprep.subr.bf16.mxu1 %v4131_v41 }
 0x123   : > { %846 = vmatmul.mubr.bf16.gmra.mrb[24].mxu1 %v2742_v10  ;;  %1103 = vmatmul.mubr.bf16.gmra.mrb[24].mxu0 %v2750_v11  ;;  %v2755_v41 = vcombine.low %v920_v36, %v921_v37  ;;  %v2774_v50 = vcombine.low %v1167_v48, %v1168_v49 }
 0x124   : > { %855 = vmatprep.mubr.bf16.mxu1 %v3651_v0  ;;  %1112 = vmatprep.mubr.bf16.mxu0 %v3651_v0 }
 0x125   : > { %1236 = vmatpush1.bf16.msra.mxu1 %v4141_v44  ;;  %v2772_v44 = vcombine.low %v1163_v42, %v1164_v43 }
 0x126   : > { %1237 = vmatprep.subr.bf16.mxu1 %v4145_v45  ;;  %v1165_v45 = vmul.bf16 %v4211_v2, %v4211_v2  ;;  %v2779_v2 = vcombine.low %v1177_v63, %v1178_v1 }
 0x129   : > { %1238 = vmatpush1.bf16.msra.mxu1 %v4147_v46  ;;  %v1166_v46 = vmul.bf16 %v4214_v3, %v4214_v3 }
 0x12a   : > { %1239 = vmatprep.subr.bf16.mxu1 %v4165_v51  ;;  %v1169_v51 = vmul.bf16 %v4247_v14, %v4247_v14 }
 0x12b   : > { %856 = vmatmul.mubr.bf16.gmra.mrb[28].mxu1 %v2743_v16  ;;  %1113 = vmatmul.mubr.bf16.gmra.mrb[28].mxu0 %v2751_v17  ;;  %v2773_v47 = vcombine.low %v1165_v45, %v1166_v46 }
 0x12c   : > { %865 = vmatprep.mubr.bf16.mxu1 %v3651_v0  ;;  %1122 = vmatprep.mubr.bf16.mxu0 %v3651_v0  ;;  %v2775_v53 = vcombine.low %v1169_v51, %v1170_v52 }
 0x12d   : > { %1240 = vmatpush1.bf16.msra.mxu1 %v4175_v54  ;;  %v1171_v54 = vmul.bf16 %v4265_v22, %v4265_v22 }
 0x12e   : > { %1241 = vmatprep.subr.bf16.mxu1 %v4179_v55  ;;  %v1172_v55 = vmul.bf16 %v417_v23, %v417_v23 }
 0x130   : > { %v2776_v56 = vcombine.low %v1171_v54, %v1172_v55 }
 0x131   : > { %1242 = vmatpush1.bf16.msra.mxu1 %v4187_v58  ;;  %v1174_v58 = vmul.bf16 %v419_v27, %v419_v27 }
 0x133   : > { %866 = vmatmul.mubr.bf16.gmra.mrb[32].mxu1 %v2744_v24  ;;  %1123 = vmatmul.mubr.bf16.gmra.mrb[32].mxu0 %v2752_v25  ;;  %v2777_v59 = vcombine.low %v1173_v57, %v1174_v58 }
 0x134   : > { %875 = vmatprep.mubr.bf16.mxu1 %v3651_v0  ;;  %1132 = vmatprep.mubr.bf16.mxu0 %v3651_v0 }
 0x13b   : > { %876 = vmatmul.mubr.bf16.gmra.mrb[36].mxu1 %v2745_v28  ;;  %1133 = vmatmul.mubr.bf16.gmra.mrb[36].mxu0 %v2753_v31 }
 0x13c   : > { %885 = vmatprep.mubr.bf16.mxu1 %v3651_v0  ;;  %1142 = vmatprep.mubr.bf16.mxu0 %v3651_v0 }
 0x143   : > { %886 = vmatmul.mubr.bf16.gmra.mrb[40].mxu1 %v2746_v34  ;;  %1143 = vmatmul.mubr.bf16.gmra.mrb[40].mxu0 %v2754_v35 }
 0x144   : > { %895 = vmatprep.mubr.bf16.mxu1 %v3651_v0  ;;  %1152 = vmatprep.mubr.bf16.mxu0 %v3651_v0 }
 0x14b   : > { %896 = vmatmul.mubr.bf16.gmra.mrb[44].mxu1 %v2747_v40  ;;  %1153 = vmatmul.mubr.bf16.gmra.mrb[44].mxu0 %v2755_v41 }
 0x14c   : > { %1259 = vmatprep.mubr.bf16.mxu1 %v3651_v0 }
 0x153   : > { %1260 = vmatmul.mubr.bf16.vlgmr.msra.gmra.mrb[48].mxu1 %v2772_v44 }
 0x154   : > { %1269 = vmatprep.mubr.bf16.mxu1 %v3651_v0 }
 0x15b   : > { %1270 = vmatmul.mubr.bf16.gmra.mrb[52].mxu1 %v2773_v47 }
 0x15c   : > { %1279 = vmatprep.mubr.bf16.mxu1 %v3651_v0 }
 0x163   : > { %1280 = vmatmul.mubr.bf16.gmra.mrb[56].mxu1 %v2774_v50 }
 0x164   : > { %1289 = vmatprep.mubr.bf16.mxu1 %v3651_v0 }
 0x16b   : > { %1290 = vmatmul.mubr.bf16.gmra.mrb[60].mxu1 %v2775_v53 }
 0x16c   : > { %1299 = vmatprep.mubr.bf16.mxu1 %v3651_v0 }
 0x173   : > { %1300 = vmatmul.mubr.bf16.gmra.mrb[64].mxu1 %v2776_v56 }
 0x174   : > { %1309 = vmatprep.mubr.bf16.mxu1 %v3651_v0 }
 0x17b   : > { %1310 = vmatmul.mubr.bf16.gmra.mrb[68].mxu1 %v2777_v59 }
 0x17c   : > { %1319 = vmatprep.mubr.bf16.mxu1 %v3651_v0 }
 0x183   : > { %1320 = vmatmul.mubr.bf16.gmra.mrb[72].mxu1 %v2778_v62 }
 0x184   : > { %1329 = vmatprep.mubr.bf16.mxu1 %v3651_v0 }
 0x18b   : > { %1330 = vmatmul.mubr.bf16.gmra.mrb[76].mxu1 %v2779_v2 }
 0x1c6   : > { %v4322_v3 = vpop.f32.mrb[0].mxu1  ;;  %v4324_v4 = vpop.f32.mrb[0].mxu0 }
 0x1c7   : > { %5714 = vst [vmem:[#allocation25_spill] sm:$0xff] %v4322_v3  ;;  %5715 = vst [vmem:[#allocation26_spill] sm:$0xff] %v4324_v4  ;;  %v4326_v5 = vpop.f32.mrb[1].mxu1  ;;  %v4328_v6 = vpop.f32.mrb[1].mxu0 }
 0x1c8   : > { %5716 = vst [vmem:[#allocation27_spill] sm:$0xff] %v4326_v5  ;;  %5717 = vst [vmem:[#allocation28_spill] sm:$0xff] %v4328_v6  ;;  %v4330_v7 = vpop.f32.mrb[2].mxu1  ;;  %v4332_v8 = vpop.f32.mrb[2].mxu0 }
 0x1c9   : > { %5718 = vst [vmem:[#allocation29_spill] sm:$0xff] %v4330_v7  ;;  %v4336_v10 = vpop.f32.mrb[3].mxu1  ;;  %v4338_v0 = vpop.f32.mrb[3].mxu0 }
 0x1ca   : > { %5719 = vst [vmem:[#allocation30_spill] sm:$0xff] %v4336_v10  ;;  %5720 = vst [vmem:[#allocation31_spill] sm:$0xff] %v4338_v0  ;;  %v3187_v0 = vld [vmem:[%s3984_s15] sm:$0xff]  }
 0x1cb   : > { %2965 = vmatprep.subr.bf16.mxu0 %v3187_v0 }
 0x1cc   : > { %2966 = vmatpush3.bf16.msra.mxu0 %v3187_v0  ;;  %v3194_v0 = vld [vmem:[%s3984_s15 + $0x38] sm:$0xff]  }
 0x1ce   : > { %v4342_v12 = vpop.f32.mrb[4].mxu1  ;;  %v4344_v13 = vpop.f32.mrb[4].mxu0 }
 0x1cf   : > { %5721 = vst [vmem:[#allocation32_spill] sm:$0xff] %v4342_v12  ;;  %v4346_v14 = vpop.f32.mrb[5].mxu1  ;;  %v4348_v15 = vpop.f32.mrb[5].mxu0 }
 0x1d0   : > { %5722 = vst [vmem:[#allocation33_spill] sm:$0xff] %v4346_v14  ;;  %v4350_v16 = vpop.f32.mrb[6].mxu1  ;;  %v4352_v17 = vpop.f32.mrb[6].mxu0 }
 0x1d1   : > { %5723 = vst [vmem:[#allocation34_spill] sm:$0xff] %v4350_v16  ;;  %v4356_v21 = vpop.f32.mrb[7].mxu1  ;;  %v4358_v22 = vpop.f32.mrb[7].mxu0 }
 0x1d2   : > { %5724 = vst [vmem:[#allocation35_spill] sm:$0xff] %v4356_v21 }
 0x1d6   : > { %v4362_v24 = vpop.f32.mrb[8].mxu1  ;;  %v4364_v25 = vpop.f32.mrb[8].mxu0 }
 0x1d7   : > { %5725 = vst [vmem:[#allocation36_spill] sm:$0xff] %v4362_v24  ;;  %v4366_v19 = vpop.f32.mrb[9].mxu1  ;;  %v4368_v20 = vpop.f32.mrb[9].mxu0 }
 0x1d8   : > { %5726 = vst [vmem:[#allocation37_spill] sm:$0xff] %v4366_v19  ;;  %v4370_v26 = vpop.f32.mrb[10].mxu1  ;;  %v4372_v27 = vpop.f32.mrb[10].mxu0 }
 0x1d9   : > { %5727 = vst [vmem:[#allocation38_spill] sm:$0xff] %v4370_v26  ;;  %v4376_v31 = vpop.f32.mrb[11].mxu1  ;;  %v4378_v32 = vpop.f32.mrb[11].mxu0 }
 0x1da   : > { %5728 = vst [vmem:[#allocation39_spill] sm:$0xff] %v4376_v31 }
 0x1de   : > { %v4382_v30 = vpop.f32.mrb[12].mxu1  ;;  %v4384_v33 = vpop.f32.mrb[12].mxu0 }
 0x1df   : > { %5729 = vst [vmem:[#allocation40_spill] sm:$0xff] %v4382_v30  ;;  %5730 = vst [vmem:[#allocation41_spill] sm:$0xff] %v4384_v33  ;;  %v4386_v34 = vpop.f32.mrb[13].mxu1  ;;  %v4388_v35 = vpop.f32.mrb[13].mxu0 }
 0x1e0   : > { %5731 = vst [vmem:[#allocation42_spill] sm:$0xff] %v4386_v34  ;;  %5732 = vst [vmem:[#allocation43_spill] sm:$0xff] %v4388_v35  ;;  %v4390_v36 = vpop.f32.mrb[14].mxu1  ;;  %v4392_v37 = vpop.f32.mrb[14].mxu0 }
 0x1e1   : > { %5733 = vst [vmem:[#allocation44_spill] sm:$0xff] %v4390_v36  ;;  %5734 = vst [vmem:[#allocation45_spill] sm:$0xff] %v4392_v37  ;;  %v4396_v39 = vpop.f32.mrb[15].mxu1  ;;  %v4398_v40 = vpop.f32.mrb[15].mxu0 }
 0x1e2   : > { %5735 = vst [vmem:[#allocation46_spill] sm:$0xff] %v4396_v39  ;;  %5736 = vst [vmem:[#allocation47_spill] sm:$0xff] %v4398_v40 }
 0x1e6   : > { %v4402_v42 = vpop.f32.mrb[16].mxu1  ;;  %v4404_v43 = vpop.f32.mrb[16].mxu0 }
 0x1e7   : > { %5737 = vst [vmem:[#allocation48_spill] sm:$0xff] %v4404_v43  ;;  %v4406_v44 = vpop.f32.mrb[17].mxu1  ;;  %v4410_v46 = vpop.f32.mrb[17].mxu0 }
 0x1e8   : > { %5738 = vst [vmem:[#allocation49_spill] sm:$0xff] %v4406_v44  ;;  %5739 = vst [vmem:[#allocation50_spill] sm:$0xff] %v4410_v46  ;;  %v4412_v47 = vpop.f32.mrb[18].mxu1  ;;  %v4416_v49 = vpop.f32.mrb[18].mxu0 }
 0x1e9   : > { %5740 = vst [vmem:[#allocation51_spill] sm:$0xff] %v4416_v49  ;;  %v4418_v50 = vpop.f32.mrb[19].mxu1  ;;  %v4422_v52 = vpop.f32.mrb[19].mxu0 }
 0x1ea   : > { %5741 = vst [vmem:[#allocation52_spill] sm:$0xff] %v4422_v52 }
 0x1ee   : > { %v4426_v54 = vpop.f32.mrb[20].mxu1  ;;  %v4428_v55 = vpop.f32.mrb[20].mxu0 }
 0x1ef   : > { %5742 = vst [vmem:[#allocation53_spill] sm:$0xff] %v4428_v55  ;;  %v1388_v56 = vmax.f32 %v4402_v42, %v4426_v54  ;;  %v4432_v57 = vpop.f32.mrb[21].mxu1  ;;  %v4436_v59 = vpop.f32.mrb[21].mxu0  ;;  %v5793_v4 = vld [vmem:[#allocation49_spill] sm:$0xff] }
 0x1f0   : > { %5743 = vst [vmem:[#allocation54_spill] sm:$0xff] %v4436_v59  ;;  %v1409_v60 = vmax.f32 %v4406_v44, %v4432_v57  ;;  %v4440_v61 = vpop.f32.mrb[22].mxu1  ;;  %v4444_v63 = vpop.f32.mrb[22].mxu0 }
 0x1f1   : > { %5744 = vst [vmem:[#allocation55_spill] sm:$0xff] %v4444_v63  ;;  %v1389_v1 = vmax.f32 %v4412_v47, %v4440_v61  ;;  %v4448_v2 = vpop.f32.mrb[23].mxu1  ;;  %v4452_v53 = vpop.f32.mrb[23].mxu0 }
 0x1f2   : > { %5745 = vst [vmem:[#allocation56_spill] sm:$0xff] %v4452_v53  ;;  %v1410_v51 = vmax.f32 %v4418_v50, %v4448_v2 }
 0x1f6   : > { %v4458_v45 = vpop.f32.mrb[24].mxu1  ;;  %v4460_v62 = vpop.f32.mrb[24].mxu0 }
 0x1f7   : > { %5746 = vst [vmem:[#allocation57_spill] sm:$0xff] %v4460_v62  ;;  %v1390_v41 = vmax.f32 %v1388_v56, %v4458_v45  ;;  %v4463_v29 = vpop.f32.mrb[25].mxu1  ;;  %v4467_v58 = vpop.f32.mrb[25].mxu0 }
 0x1f8   : > { %5747 = vst [vmem:[#allocation58_spill] sm:$0xff] %v4467_v58  ;;  %v1411_v23 = vmax.f32 %v1409_v60, %v4463_v29  ;;  %v4470_v18 = vpop.f32.mrb[26].mxu1  ;;  %v4474_v9 = vpop.f32.mrb[26].mxu0 }
 0x1f9   : > { %5748 = vst [vmem:[#allocation59_spill] sm:$0xff] %v4474_v9  ;;  %v1391_v38 = vmax.f32 %v1389_v1, %v4470_v18  ;;  %v4477_v11 = vpop.f32.mrb[27].mxu1  ;;  %v4481_v53 = vpop.f32.mrb[27].mxu0 }
 0x1fa   : > { %5749 = vst [vmem:[#allocation60_spill] sm:$0xff] %v4481_v53  ;;  %v1412_v28 = vmax.f32 %v1410_v51, %v4477_v11 }
 0x1fe   : > { %v4486_v62 = vpop.f32.mrb[28].mxu1  ;;  %v4488_v63 = vpop.f32.mrb[28].mxu0 }
 0x1ff   : > { %5750 = vst [vmem:[#allocation61_spill] sm:$0xff] %v4488_v63  ;;  %v1392_v48 = vmax.f32 %v1390_v41, %v4486_v62  ;;  %v4491_v58 = vpop.f32.mrb[29].mxu1  ;;  %v4495_v59 = vpop.f32.mrb[29].mxu0 }
 0x200   : > { %5751 = vst [vmem:[#allocation62_spill] sm:$0xff] %v4491_v58  ;;  %5752 = vst [vmem:[#allocation63_spill] sm:$0xff] %v4495_v59  ;;  %v1413_v56 = vmax.f32 %v1411_v23, %v4491_v58  ;;  %v4498_v9 = vpop.f32.mrb[30].mxu1  ;;  %v4502_v60 = vpop.f32.mrb[30].mxu0 }
 0x201   : > { %5753 = vst [vmem:[#allocation64_spill] sm:$0xff] %v4502_v60  ;;  %v1393_v53 = vmax.f32 %v1391_v38, %v4498_v9  ;;  %v4505_v55 = vpop.f32.mrb[31].mxu1  ;;  %v4509_v52 = vpop.f32.mrb[31].mxu0 }
 0x202   : > { %5754 = vst [vmem:[#allocation65_spill] sm:$0xff] %v4509_v52  ;;  %v1414_v1 = vmax.f32 %v1412_v28, %v4505_v55 }
 0x206   : > { %v4514_v63 = vpop.f32.mrb[32].mxu1  ;;  %v4516_v49 = vpop.f32.mrb[32].mxu0 }
 0x207   : > { %5755 = vst [vmem:[#allocation66_spill] sm:$0xff] %v4516_v49  ;;  %v1394_v51 = vmax.f32 %v1392_v48, %v4514_v63  ;;  %v4521_v59 = vpop.f32.mrb[33].mxu1  ;;  %v4523_v46 = vpop.f32.mrb[33].mxu0 }
 0x208   : > { %5756 = vst [vmem:[#allocation67_spill] sm:$0xff] %v4521_v59  ;;  %5757 = vst [vmem:[#allocation68_spill] sm:$0xff] %v4523_v46  ;;  %v1415_v41 = vmax.f32 %v1413_v56, %v4521_v59  ;;  %v4528_v60 = vpop.f32.mrb[34].mxu1  ;;  %v4530_v23 = vpop.f32.mrb[34].mxu0 }
 0x209   : > { %5758 = vst [vmem:[#allocation69_spill] sm:$0xff] %v4530_v23  ;;  %v1395_v52 = vmax.f32 %v1393_v53, %v4528_v60  ;;  %v4535_v43 = vpop.f32.mrb[35].mxu1  ;;  %v4537_v38 = vpop.f32.mrb[35].mxu0 }
 0x20a   : > { %5759 = vst [vmem:[#allocation70_spill] sm:$0xff] %v4537_v38  ;;  %v1416_v49 = vmax.f32 %v1414_v1, %v4535_v43 }
 0x20e   : > { %v4542_v3 = vpop.f32.mrb[36].mxu1  ;;  %v4544_v28 = vpop.f32.mrb[36].mxu0 }
 0x20f   : > { %5760 = vst [vmem:[#allocation71_spill] sm:$0xff] %v4544_v28  ;;  %v1396_v46 = vmax.f32 %v1394_v51, %v4542_v3  ;;  %v4549_v5 = vpop.f32.mrb[37].mxu1  ;;  %v4551_v48 = vpop.f32.mrb[37].mxu0 }
 0x210   : > { %5761 = vst [vmem:[#allocation72_spill] sm:$0xff] %v4549_v5  ;;  %5762 = vst [vmem:[#allocation73_spill] sm:$0xff] %v4551_v48  ;;  %v1417_v23 = vmax.f32 %v1415_v41, %v4549_v5  ;;  %v4556_v7 = vpop.f32.mrb[38].mxu1  ;;  %v4558_v56 = vpop.f32.mrb[38].mxu0 }
 0x211   : > { %5763 = vst [vmem:[#allocation74_spill] sm:$0xff] %v4558_v56  ;;  %v1397_v38 = vmax.f32 %v1395_v52, %v4556_v7  ;;  %v4563_v10 = vpop.f32.mrb[39].mxu1  ;;  %v4565_v53 = vpop.f32.mrb[39].mxu0 }
 0x212   : > { %5764 = vst [vmem:[#allocation75_spill] sm:$0xff] %v4565_v53  ;;  %v1418_v28 = vmax.f32 %v1416_v49, %v4563_v10 }
 0x216   : > { %v4570_v12 = vpop.f32.mrb[40].mxu1  ;;  %v4572_v1 = vpop.f32.mrb[40].mxu0 }
 0x217   : > { %5765 = vst [vmem:[#allocation76_spill] sm:$0xff] %v4572_v1  ;;  %v1398_v48 = vmax.f32 %v1396_v46, %v4570_v12  ;;  %v4577_v14 = vpop.f32.mrb[41].mxu1  ;;  %v4579_v51 = vpop.f32.mrb[41].mxu0 }
 0x218   : > { %5766 = vst [vmem:[#allocation77_spill] sm:$0xff] %v4577_v14  ;;  %5767 = vst [vmem:[#allocation78_spill] sm:$0xff] %v4579_v51  ;;  %v1419_v56 = vmax.f32 %v1417_v23, %v4577_v14  ;;  %v4584_v16 = vpop.f32.mrb[42].mxu1  ;;  %v4586_v41 = vpop.f32.mrb[42].mxu0 }
 0x219   : > { %5768 = vst [vmem:[#allocation79_spill] sm:$0xff] %v4586_v41  ;;  %v1399_v53 = vmax.f32 %v1397_v38, %v4584_v16  ;;  %v4591_v21 = vpop.f32.mrb[43].mxu1  ;;  %v4593_v52 = vpop.f32.mrb[43].mxu0 }
 0x21a   : > { %5769 = vst [vmem:[#allocation80_spill] sm:$0xff] %v4593_v52  ;;  %v1420_v1 = vmax.f32 %v1418_v28, %v4591_v21 }
 0x21e   : > { %v4598_v24 = vpop.f32.mrb[44].mxu1  ;;  %v4600_v49 = vpop.f32.mrb[44].mxu0 }
 0x21f   : > { %5770 = vst [vmem:[#allocation81_spill] sm:$0xff] %v4600_v49  ;;  %v1400_v51 = vmax.f32 %v1398_v48, %v4598_v24  ;;  %v4605_v19 = vpop.f32.mrb[45].mxu1  ;;  %v4607_v46 = vpop.f32.mrb[45].mxu0 }
 0x220   : > { %5771 = vst [vmem:[#allocation82_spill] sm:$0xff] %v4607_v46  ;;  %v1421_v41 = vmax.f32 %v1419_v56, %v4605_v19  ;;  %v4612_v26 = vpop.f32.mrb[46].mxu1  ;;  %v4614_v23 = vpop.f32.mrb[46].mxu0 }
 0x221   : > { %5772 = vst [vmem:[#allocation83_spill] sm:$0xff] %v4614_v23  ;;  %v1401_v52 = vmax.f32 %v1399_v53, %v4612_v26  ;;  %v4619_v31 = vpop.f32.mrb[47].mxu1  ;;  %v4621_v38 = vpop.f32.mrb[47].mxu0 }
 0x222   : > { %5773 = vst [vmem:[#allocation84_spill] sm:$0xff] %v4621_v38  ;;  %v1422_v49 = vmax.f32 %v1420_v1, %v4619_v31 }
 0x223   : > { %v1402_v30 = vmax.f32 %v1400_v51, %v1401_v52  ;;  %v3189_v51 = vld [vmem:[%s3984_s15 + $0x10] sm:$0xff]  }
 0x224   : > { %v1423_v28 = vmax.f32 %v1421_v41, %v1422_v49 }
 0x225   : > { %v1403_v46 = vrot.slane %v1402_v30, 4 }
 0x226   : > { %v1424_v34 = vrot.slane %v1423_v28, 4  ;;  %v4626_v37 = vpop.f32.mrb[48].mxu1 }
 0x227   : > { %v1404_v40 = vmax.f32 %v1402_v30, %v1403_v46  ;;  %v4630_v48 = vpop.f32.mrb[49].mxu1 }
 0x228   : > { %5774 = vst [vmem:[#allocation85_spill] sm:$0xff] %v4630_v48  ;;  %v1425_v23 = vmax.f32 %v1423_v28, %v1424_v34  ;;  %v4634_v1 = vpop.f32.mrb[50].mxu1 }
 0x229   : > { %v4638_v41 = vpop.f32.mrb[51].mxu1  ;;  %v1405_v52 = vrot.slane %v1404_v40, 2 }
 0x22a   : > { %v1426_v49 = vrot.slane %v1425_v23, 2 }
 0x22b   : > { %v1406_v46 = vmax.f32 %v1404_v40, %v1405_v52 }
 0x22c   : > { %v1427_v56 = vmax.f32 %v1425_v23, %v1426_v49 }
 0x22d   : > { %v1407_v53 = vrot.slane %v1406_v46, 1 }
 0x22e   : > { %v4642_v38 = vpop.f32.mrb[52].mxu1  ;;  %v1428_v34 = vrot.slane %v1427_v56, 1 }
 0x22f   : > { %v4646_v36 = vpop.f32.mrb[53].mxu1  ;;  %v1408_v39 = vmax.f32 %v1406_v46, %v1407_v53 }
 0x230   : > { %v4650_v48 = vpop.f32.mrb[54].mxu1  ;;  %v1429_v44 = vmax.f32 %v1427_v56, %v1428_v34  ;;  %v3188_v56 = vld [vmem:[%s3984_s15 + $0x8] sm:$0xff]  }
 0x231   : > { %v4654_v23 = vpop.f32.mrb[55].mxu1  ;;  %2967 = vmatprep.subr.bf16.mxu0 %v3188_v56 }
 0x232   : > { %v1430_v49 = vmax.f32 %v1408_v39, %v1429_v44  ;;  %2968 = vmatpush3.bf16.msra.mxu0 %v3188_v56  ;;  %v3191_v39 = vld [vmem:[%s3984_s15 + $0x20] sm:$0xff]  }
 0x233   : > { %2969 = vmatprep.subr.bf16.mxu0 %v3189_v51 }
 0x234   : > { %1431 = vmax.xlane.f32.xlu0 %v1430_v49  ;;  %v3192_v49 = vld [vmem:[%s3984_s15 + $0x28] sm:$0xff]  }
 0x236   : > { %v4658_v28 = vpop.f32.mrb[56].mxu1  ;;  %2970 = vmatpush3.bf16.msra.mxu0 %v3189_v51  ;;  %v5791_v51 = vsub.f32 %v4402_v42, %v4626_v37  ;;  %v5797_v37 = vsub.f32 %v4426_v54, %v4642_v38 }
 0x237   : > { %v4662_v46 = vpop.f32.mrb[57].mxu1  ;;  %v5801_v54 = vsub.f32 %v4458_v45, %v4658_v28 }
 0x238   : > { %v4666_v34 = vpop.f32.mrb[58].mxu1 }
 0x239   : > { %v4670_v40 = vpop.f32.mrb[59].mxu1 }
 0x23a   : > { %5775 = vst [vmem:[#allocation86_spill] sm:$0xff] %v4670_v40 }
 0x23e   : > { %v4674_v44 = vpop.f32.mrb[60].mxu1 }
 0x23f   : > { %5776 = vst [vmem:[#allocation87_spill] sm:$0xff] %v4674_v44  ;;  %v4678_v53 = vpop.f32.mrb[61].mxu1 }
 0x240   : > { %5777 = vst [vmem:[#allocation88_spill] sm:$0xff] %v4678_v53  ;;  %v4682_v52 = vpop.f32.mrb[62].mxu1 }
 0x241   : > { %v4686_v30 = vpop.f32.mrb[63].mxu1 }
 0x242   : > { %5778 = vst [vmem:[#allocation89_spill] sm:$0xff] %v4686_v30 }
 0x246   : > { %v4690_v40 = vpop.f32.mrb[64].mxu1 }
 0x247   : > { %5779 = vst [vmem:[#allocation90_spill] sm:$0xff] %v4690_v40  ;;  %v4694_v44 = vpop.f32.mrb[65].mxu1 }
 0x248   : > { %5780 = vst [vmem:[#allocation91_spill] sm:$0xff] %v4694_v44  ;;  %v4698_v53 = vpop.f32.mrb[66].mxu1 }
 0x249   : > { %v4702_v58 = vpop.f32.mrb[67].mxu1 }
 0x24a   : > { %5781 = vst [vmem:[#allocation92_spill] sm:$0xff] %v4702_v58 }
 0x24e   : > { %v4706_v30 = vpop.f32.mrb[68].mxu1 }
 0x24f   : > { %5782 = vst [vmem:[#allocation93_spill] sm:$0xff] %v4706_v30  ;;  %v4710_v40 = vpop.f32.mrb[69].mxu1 }
 0x250   : > { %5783 = vst [vmem:[#allocation94_spill] sm:$0xff] %v4710_v40  ;;  %v4714_v44 = vpop.f32.mrb[70].mxu1 }
 0x251   : > { %v4718_v59 = vpop.f32.mrb[71].mxu1 }
 0x252   : > { %5784 = vst [vmem:[#allocation95_spill] sm:$0xff] %v4718_v59 }
 0x256   : > { %v4722_v58 = vpop.f32.mrb[72].mxu1 }
 0x257   : > { %5785 = vst [vmem:[#allocation96_spill] sm:$0xff] %v4722_v58  ;;  %v4726_v30 = vpop.f32.mrb[73].mxu1 }
 0x258   : > { %5786 = vst [vmem:[#allocation97_spill] sm:$0xff] %v4726_v30  ;;  %v4730_v40 = vpop.f32.mrb[74].mxu1 }
 0x259   : > { %v4734_v5 = vpop.f32.mrb[75].mxu1 }
 0x25e   : > { %v4738_v59 = vpop.f32.mrb[76].mxu1 }
 0x25f   : > { %5787 = vst [vmem:[#allocation98_spill] sm:$0xff] %v4738_v59  ;;  %v4742_v58 = vpop.f32.mrb[77].mxu1  ;;  %v3193_v59 = vld [vmem:[%s3984_s15 + $0x30] sm:$0xff]  }
 0x260   : > { %5788 = vst [vmem:[#allocation99_spill] sm:$0xff] %v4742_v58  ;;  %v4746_v30 = vpop.f32.mrb[78].mxu1  ;;  %v3190_v58 = vld [vmem:[%s3984_s15 + $0x18] sm:$0xff]  }
 0x261   : > { %v4750_v14 = vpop.f32.mrb[79].mxu1  ;;  %2971 = vmatprep.subr.bf16.mxu0 %v3190_v58 }
 0x262   : > { %2972 = vmatpush3.bf16.msra.mxu0 %v3190_v58  ;;  %v5792_v58 = vsub.f32 %v4412_v47, %v4634_v1  ;;  %v5798_v47 = vsub.f32 %v4440_v61, %v4650_v48 }
 0x263   : > { %2973 = vmatprep.subr.bf16.mxu0 %v3191_v39 }
 0x266   : > { %2974 = vmatpush3.bf16.msra.mxu0 %v3191_v39 }
 0x267   : > { %2975 = vmatprep.subr.bf16.mxu0 %v3192_v49 }
 0x26a   : > { %2976 = vmatpush3.bf16.msra.mxu0 %v3192_v49  ;;  %v5794_v49 = vld [vmem:[#allocation85_spill] sm:$0xff] }
 0x26b   : > { %2977 = vmatprep.subr.bf16.mxu0 %v3193_v59  ;;  %v5795_v35 = vsub.f32 %v5793_v4, %v5794_v49  ;;  %v5799_v4 = vsub.f32 %v4432_v57, %v4646_v36  ;;  %v5802_v36 = vsub.f32 %v4470_v18, %v4666_v34  ;;  %v5806_v18 = vld [vmem:[#allocation87_spill] sm:$0xff] }
 0x26c   : > { %v5807_v34 = vsub.f32 %v4486_v62, %v5806_v18 }
 0x26e   : > { %2978 = vmatpush3.bf16.msra.mxu0 %v3193_v59 }
 0x26f   : > { %2979 = vmatprep.subr.bf16.mxu0 %v3194_v0 }
 0x272   : > { %2980 = vmatpush3.bf16.msra.mxu0 %v3194_v0  ;;  %v5796_v0 = vsub.f32 %v4418_v50, %v4638_v41  ;;  %v5800_v50 = vsub.f32 %v4448_v2, %v4654_v23 }
 0x2c1   : > { %v4778_v56 = vpop.xlane.xlu0 %1431 }
 0x2c2   : > { %v1625_v6 = vsub.f32 %v5791_v51, %v4778_v56  ;;  %v1627_v39 = vsub.f32 %v5792_v58, %v4778_v56  ;;  %v1626_v59 = vsub.f32 %v5795_v35, %v4778_v56  ;;  %v1628_v33 = vsub.f32 %v5796_v0, %v4778_v56 }
 0x2c3   : > { %v1629_v42 = vsub.f32 %v5797_v37, %v4778_v56  ;;  %v1631_v1 = vsub.f32 %v5798_v47, %v4778_v56  ;;  %v1630_v35 = vsub.f32 %v5799_v4, %v4778_v56  ;;  %v1632_v41 = vsub.f32 %v5800_v50, %v4778_v56  ;;  %v5809_v4 = vld [vmem:[#allocation62_spill] sm:$0xff] }
 0x2c4   : > { %v1657_v51 = vmul.f32 1.442695, %v1625_v6  ;;  %v1661_v58 = vmul.f32 1.442695, %v1627_v39  ;;  %v1659_v49 = vmul.f32 1.442695, %v1626_v59  ;;  %v1633_v38 = vsub.f32 %v5801_v54, %v4778_v56 }
 0x2c5   : > { %v1663_v61 = vmul.f32 1.442695, %v1628_v33  ;;  %v1665_v48 = vmul.f32 1.442695, %v1629_v42  ;;  %v1669_v0 = vmul.f32 1.442695, %v1631_v1  ;;  %v1635_v57 = vsub.f32 %v5802_v36, %v4778_v56 }
 0x2c6   : > { %3227 = vpow2.f32 %v1657_v51  ;;  %v1667_v37 = vmul.f32 1.442695, %v1630_v35  ;;  %v1671_v2 = vmul.f32 1.442695, %v1632_v41  ;;  %v1673_v23 = vmul.f32 1.442695, %v1633_v38 }
 0x2c7   : > { %3229 = vpow2.f32 %v1661_v58  ;;  %v1677_v6 = vmul.f32 1.442695, %v1635_v57  ;;  %v5803_v39 = vsub.f32 %v4463_v29, %v4662_v46  ;;  %v5804_v33 = vld [vmem:[#allocation86_spill] sm:$0xff]  ;;  %v1637_v42 = vsub.f32 %v5807_v34, %v4778_v56  ;;  %v5810_v29 = vld [vmem:[#allocation88_spill] sm:$0xff]  ;;  %v5812_v41 = vld [vmem:[#allocation89_spill] sm:$0xff] }
 0x2c8   : > { %v5805_v28 = vsub.f32 %v4477_v11, %v5804_v33  ;;  %3231 = vpow2.f32 %v1659_v49  ;;  %v5808_v47 = vsub.f32 %v4498_v9, %v4682_v52  ;;  %v5811_v46 = vsub.f32 %v5809_v4, %v5810_v29  ;;  %v5814_v52 = vld [vmem:[#allocation90_spill] sm:$0xff]  ;;  %v5825_v4 = vld [vmem:[#allocation72_spill] sm:$0xff] }
 0x2c9   : > { %v1634_v45 = vsub.f32 %v5803_v39, %v4778_v56  ;;  %3233 = vpow2.f32 %v1663_v61  ;;  %v5813_v51 = vsub.f32 %v4505_v55, %v5812_v41  ;;  %v1681_v62 = vmul.f32 1.442695, %v1637_v42  ;;  %v5817_v55 = vld [vmem:[#allocation67_spill] sm:$0xff]  ;;  %v5826_v29 = vld [vmem:[#allocation94_spill] sm:$0xff] }
 0x2ca   : > { %v1636_v59 = vsub.f32 %v5805_v28, %v4778_v56  ;;  %v1639_v1 = vsub.f32 %v5808_v47, %v4778_v56  ;;  %v1638_v35 = vsub.f32 %v5811_v46, %v4778_v56  ;;  %3235 = vpow2.f32 %v1665_v48  ;;  %v5818_v39 = vld [vmem:[#allocation91_spill] sm:$0xff] }
 0x2cb   : > { %v1675_v50 = vmul.f32 1.442695, %v1634_v45  ;;  %v1640_v58 = vsub.f32 %v5813_v51, %v4778_v56  ;;  %3237 = vpow2.f32 %v1669_v0  ;;  %v5815_v38 = vsub.f32 %v4514_v63, %v5814_v52  ;;  %v5820_v0 = vld [vmem:[#allocation92_spill] sm:$0xff]  ;;  %v5822_v63 = vld [vmem:[#allocation93_spill] sm:$0xff] }
 0x2cc   : > { %v1679_v11 = vmul.f32 1.442695, %v1636_v59  ;;  %v1685_v49 = vmul.f32 1.442695, %v1639_v1  ;;  %v1683_v54 = vmul.f32 1.442695, %v1638_v35  ;;  %v5816_v61 = vsub.f32 %v4528_v60, %v4698_v53 }
 0x2cd   : > { %v1687_v9 = vmul.f32 1.442695, %v1640_v58  ;;  %v1641_v36 = vsub.f32 %v5815_v38, %v4778_v56  ;;  %3239 = vpow2.f32 %v1667_v37  ;;  %v5819_v48 = vsub.f32 %v5817_v55, %v5818_v39  ;;  %v5833_v52 = vld [vmem:[#allocation77_spill] sm:$0xff] }
 0x2ce   : > { %v1643_v57 = vsub.f32 %v5816_v61, %v4778_v56  ;;  %v5821_v33 = vsub.f32 %v4535_v43, %v5820_v0  ;;  %v5823_v59 = vsub.f32 %v4542_v3, %v5822_v63  ;;  %3241 = vpow2.f32 %v1671_v2  ;;  %v5828_v2 = vld [vmem:[#allocation95_spill] sm:$0xff]  ;;  %v5834_v38 = vld [vmem:[#allocation97_spill] sm:$0xff] }
 0x2cf   : > { %v1642_v45 = vsub.f32 %v5819_v48, %v4778_v56  ;;  %v1689_v34 = vmul.f32 1.442695, %v1641_v36  ;;  %v5824_v53 = vsub.f32 %v4556_v7, %v4714_v44  ;;  %3243 = vpow2.f32 %v1673_v23  ;;  %v5830_v7 = vld [vmem:[#allocation96_spill] sm:$0xff] }
 0x2d0   : > { %v1644_v28 = vsub.f32 %v5821_v33, %v4778_v56  ;;  %v1645_v18 = vsub.f32 %v5823_v59, %v4778_v56  ;;  %v1693_v60 = vmul.f32 1.442695, %v1643_v57  ;;  %3245 = vpow2.f32 %v1677_v6  ;;  %v3228_v51 = vpop.eup %3227 }
 0x2d1   : > { %v1647_v37 = vsub.f32 %v5824_v53, %v4778_v56  ;;  %v1691_v42 = vmul.f32 1.442695, %v1642_v45  ;;  %v5827_v3 = vsub.f32 %v5825_v4, %v5826_v29  ;;  %v5829_v35 = vsub.f32 %v4563_v10, %v5828_v2  ;;  %v3230_v57 = vpop.eup %3229 }
 0x2d2   : > { %v1695_v47 = vmul.f32 1.442695, %v1644_v28  ;;  %v1697_v1 = vmul.f32 1.442695, %v1645_v18  ;;  %3247 = vpow2.f32 %v1675_v50  ;;  %v5831_v44 = vsub.f32 %v4570_v12, %v5830_v7  ;;  %v3232_v39 = vpop.eup %3231 }
 0x2d3   : > { %v4868_v43 = vmul.f32 1.442695, %v1647_v37  ;;  %v1646_v46 = vsub.f32 %v5827_v3, %v4778_v56  ;;  %v1648_v41 = vsub.f32 %v5829_v35, %v4778_v56  ;;  %v5832_v6 = vsub.f32 %v4584_v16, %v4730_v40  ;;  %v3234_v16 = vpop.eup %3233 }
 0x2d4   : > { %v1649_v23 = vsub.f32 %v5831_v44, %v4778_v56  ;;  %v5835_v36 = vsub.f32 %v5833_v52, %v5834_v38  ;;  %v1721_v10 = vadd.f32 0.0001, %v3228_v51  ;;  %3249 = vpow2.f32 %v1679_v11  ;;  %v3236_v11 = vpop.eup %3235 }
 0x2d5   : > { %v1651_v58 = vsub.f32 %v5832_v6, %v4778_v56  ;;  %v1699_v55 = vmul.f32 1.442695, %v1646_v46  ;;  %v4890_v50 = vmul.f32 1.442695, %v1648_v41  ;;  %v1723_v48 = vadd.f32 0.0001, %v3230_v57 }
 0x2d6   : > { %v1650_v61 = vsub.f32 %v5835_v36, %v4778_v56  ;;  %3251 = vpow2.f32 %v1681_v62  ;;  %v4892_v12 = vmul.f32 1.442695, %v1649_v23  ;;  %v1722_v40 = vadd.f32 0.0001, %v3232_v39  ;;  %v3238_v62 = vpop.eup %3237 }
 0x2d7   : > { %v4894_v45 = vmul.f32 1.442695, %v1651_v58  ;;  %3253 = vpow2.f32 %v1685_v49  ;;  %v5836_v0 = vsub.f32 %v4591_v21, %v4734_v5  ;;  %v1769_v63 = vpack.c.bf16 %v1723_v48, %v1721_v10  ;;  %v5837_v49 = vld [vmem:[#allocation98_spill] sm:$0xff]  ;;  %v3240_v3 = vpop.eup %3239 }
 0x2d8   : > { %v4900_v28 = vmul.f32 1.442695, %v1650_v61  ;;  %v2203_v59 = vadd.f32 %v1723_v48, %v1721_v10  ;;  %v1724_v18 = vadd.f32 0.0001, %v3234_v16  ;;  %3255 = vpow2.f32 %v1683_v54  ;;  %v3242_v2 = vpop.eup %3241 }
 0x2d9   : > { %v1652_v33 = vsub.f32 %v5836_v0, %v4778_v56  ;;  %v1725_v53 = vadd.f32 0.0001, %v3236_v11  ;;  %3257 = vpow2.f32 %v1687_v9  ;;  %v5838_v4 = vsub.f32 %v4598_v24, %v5837_v49  ;;  %1785 = vxpose.xlu0.c.b16.start [1/8] %v1769_v63, 128  ;;  %v3244_v51 = vpop.eup %3243 }
 0x2da   : > { %v1770_v5 = vpack.c.bf16 %v1724_v18, %v1722_v40  ;;  %v2224_v21 = vadd.f32 %v1724_v18, %v1722_v40  ;;  %v1727_v46 = vadd.f32 0.0001, %v3238_v62  ;;  %3259 = vpow2.f32 %v1689_v34  ;;  %v3246_v23 = vpop.eup %3245 }
 0x2db   : > { %v4902_v37 = vmul.f32 1.442695, %v1652_v33  ;;  %v1653_v29 = vsub.f32 %v5838_v4, %v4778_v56  ;;  %v2204_v35 = vadd.f32 %v2203_v59, %v1725_v53  ;;  %v1726_v41 = vadd.f32 0.0001, %v3240_v3 }
 0x2dc   : > { %3261 = vpow2.f32 %v1693_v60  ;;  %v5839_v54 = vsub.f32 %v4612_v26, %v4746_v30  ;;  %1801 = vxpose.xlu1.c.b16.start [1/8] %v1770_v5, 128  ;;  %v1771_v7 = vpack.c.bf16 %v1727_v46, %v1725_v53  ;;  %v1728_v24 = vadd.f32 0.0001, %v3242_v2  ;;  %v3248_v34 = vpop.eup %3247 }
 0x2dd   : > { %3263 = vpow2.f32 %v1691_v42  ;;  %v1713_v44 = vmul.f32 1.442695, %v1653_v29  ;;  %v2205_v6 = vadd.f32 %v2204_v35, %v1727_v46  ;;  %v2225_v58 = vadd.f32 %v2224_v21, %v1726_v41 }
 0x2de   : > { %v1655_v9 = vsub.f32 %v5839_v54, %v4778_v56  ;;  %v1729_v52 = vadd.f32 0.0001, %v3244_v51  ;;  %3265 = vpow2.f32 %v1695_v47  ;;  %1786 = vxpose.xlu0.c.b16.cont [2/8] %v1771_v7, 128  ;;  %v1772_v38 = vpack.c.bf16 %v1728_v24, %v1726_v41  ;;  %v3250_v61 = vpop.eup %3249  ;;  %v5840_v47 = vld [vmem:[#allocation99_spill] sm:$0xff] }
 0x2df   : > { %v1731_v60 = vadd.f32 0.0001, %v3246_v23  ;;  %3267 = vpow2.f32 %v1697_v1  ;;  %v2226_v26 = vadd.f32 %v2225_v58, %v1728_v24  ;;  %v1730_v57 = vadd.f32 0.0001, %v3248_v34 }
 0x2e0   : > { %v1717_v36 = vmul.f32 1.442695, %v1655_v9  ;;  %v2206_v30 = vadd.f32 %v2205_v6, %v1729_v52  ;;  %3269 = vpow2.f32 %v4868_v43  ;;  %v3252_v10 = vpop.eup %3251  ;;  %1802 = vxpose.xlu1.c.b16.cont [2/8] %v1772_v38, 128  ;;  %v1732_v39 = vadd.f32 0.0001, %v3250_v61 }
 0x2e1   : > { %v1773_v42 = vpack.c.bf16 %v1731_v60, %v1729_v52  ;;  %3271 = vpow2.f32 %v1699_v55  ;;  %v5841_v48 = vsub.f32 %v4605_v19, %v5840_v47  ;;  %v3254_v40 = vpop.eup %3253  ;;  %v2227_v1 = vadd.f32 %v2226_v26, %v1730_v57 }
 0x2e2   : > { %v2207_v0 = vadd.f32 %v2206_v30, %v1731_v60  ;;  %v1733_v33 = vadd.f32 0.0001, %v3252_v10  ;;  %3273 = vpow2.f32 %v4890_v50  ;;  %v3256_v11 = vpop.eup %3255  ;;  %v1774_v63 = vpack.c.bf16 %v1732_v39, %v1730_v57 }
 0x2e3   : > { %v1654_v16 = vsub.f32 %v5841_v48, %v4778_v56  ;;  %1787 = vxpose.xlu0.c.b16.cont [3/8] %v1773_v42, 128  ;;  %v1735_v43 = vadd.f32 0.0001, %v3254_v40  ;;  %3275 = vpow2.f32 %v4892_v12  ;;  %v5842_v55 = vsub.f32 %v4619_v31, %v4750_v14  ;;  %v3258_v18 = vpop.eup %3257 }
 0x2e4   : > { %v2228_v19 = vadd.f32 %v2227_v1, %v1732_v39  ;;  %v2208_v62 = vadd.f32 %v2207_v0, %v1733_v33  ;;  %v1734_v53 = vadd.f32 0.0001, %v3256_v11  ;;  %3277 = vpow2.f32 %v4894_v45  ;;  %v3260_v49 = vpop.eup %3259  ;;  %1803 = vxpose.xlu1.c.b16.cont [3/8] %v1774_v63, 128 }
 0x2e5   : > { %v1656_v59 = vsub.f32 %v5842_v55, %v4778_v56  ;;  %v1775_v50 = vpack.c.bf16 %v1735_v43, %v1733_v33  ;;  %v1736_v4 = vadd.f32 0.0001, %v3258_v18  ;;  %3279 = vpow2.f32 %v4900_v28 }
 0x2e6   : > { %v1715_v29 = vmul.f32 1.442695, %v1654_v16  ;;  %v3262_v3 = vpop.eup %3261  ;;  %v2209_v12 = vadd.f32 %v2208_v62, %v1735_v43  ;;  %v2229_v5 = vadd.f32 %v2228_v19, %v1734_v53  ;;  %v1737_v21 = vadd.f32 0.0001, %v3260_v49 }
 0x2e7   : > { %3281 = vpow2.f32 %v4902_v37  ;;  %v3264_v14 = vpop.eup %3263  ;;  %1788 = vxpose.xlu0.c.b16.cont [4/8] %v1775_v50, 128  ;;  %v1776_v31 = vpack.c.bf16 %v1736_v4, %v1734_v53  ;;  %v1739_v56 = vadd.f32 0.0001, %v3262_v3  ;;  %v1719_v46 = vmul.f32 1.442695, %v1656_v59 }
 0x2e8   : > { %3283 = vpow2.f32 %v1713_v44  ;;  %v3266_v45 = vpop.eup %3265  ;;  %v2230_v2 = vadd.f32 %v2229_v5, %v1736_v4  ;;  %v2210_v35 = vadd.f32 %v2209_v12, %v1737_v21  ;;  %v1738_v41 = vadd.f32 0.0001, %v3264_v14 }
 0x2e9   : > { %3285 = vpow2.f32 %v1717_v36  ;;  %v3268_v54 = vpop.eup %3267  ;;  %1804 = vxpose.xlu1.c.b16.cont [4/8] %v1776_v31, 128  ;;  %v1777_v28 = vpack.c.bf16 %v1739_v56, %v1737_v21  ;;  %v1740_v9 = vadd.f32 0.0001, %v3266_v45  ;;  %v4930_v31 = vld [vmem:[#allocation11 + $0x40] sm:$0xff]  }
 0x2ea   : > { %3287 = vpow2.f32 %v1715_v29  ;;  %v3270_v51 = vpop.eup %3269  ;;  %v2211_v7 = vadd.f32 %v2210_v35, %v1739_v56  ;;  %v2231_v24 = vadd.f32 %v2230_v2, %v1738_v41  ;;  %v1741_v37 = vadd.f32 0.0001, %v3268_v54  ;;  %2901 = vmatprep.subr.bf16.mxu0 %v4930_v31  ;;  %v5843_v56 = vld [vmem:[#allocation29_spill] sm:$0xff]  ;;  %v5846_v2 = vld [vmem:[#allocation26_spill] sm:$0xff]  ;;  %v5847_v35 = vld [vmem:[#allocation28_spill] sm:$0xff] }
 0x2eb   : > { %3289 = vpow2.f32 %v1719_v46  ;;  %v3272_v23 = vpop.eup %3271  ;;  %1789 = vxpose.xlu0.c.b16.cont [5/8] %v1777_v28, 128  ;;  %v1778_v6 = vpack.c.bf16 %v1740_v9, %v1738_v41  ;;  %v1743_v44 = vadd.f32 0.0001, %v3270_v51  ;;  %v5844_v46 = vld [vmem:[#allocation30_spill] sm:$0xff]  ;;  %v5848_v41 = vmax.f32 %v5846_v2, %v5847_v35  ;;  %v5849_v54 = vld [vmem:[#allocation40_spill] sm:$0xff]  ;;  %v5852_v51 = vld [vmem:[#allocation31_spill] sm:$0xff] }
 0x2ec   : > { %v3274_v58 = vpop.eup %3273  ;;  %v2232_v52 = vadd.f32 %v2231_v24, %v1740_v9  ;;  %v2212_v34 = vadd.f32 %v2211_v7, %v1741_v37  ;;  %v1742_v38 = vadd.f32 0.0001, %v3272_v23  ;;  %v5845_v45 = vmax.f32 %v5843_v56, %v5844_v46  ;;  %v5850_v28 = vld [vmem:[#allocation42_spill] sm:$0xff] }
 0x2ed   : > { %v3276_v60 = vpop.eup %3275  ;;  %1805 = vxpose.xlu1.c.b16.cont [5/8] %v1778_v6, 128  ;;  %v1779_v36 = vpack.c.bf16 %v1743_v44, %v1741_v37  ;;  %v1744_v61 = vadd.f32 0.0001, %v3274_v58  ;;  %v5851_v9 = vmax.f32 %v5849_v54, %v5850_v28  ;;  %v5853_v7 = vmax.f32 %v4332_v8, %v5852_v51  ;;  %v5859_v58 = vld [vmem:[#allocation43_spill] sm:$0xff] }
 0x2ee   : > { %v3278_v26 = vpop.eup %3277  ;;  %v2213_v30 = vadd.f32 %v2212_v34, %v1743_v44  ;;  %v2233_v57 = vadd.f32 %v2232_v52, %v1742_v38  ;;  %v1745_v10 = vadd.f32 0.0001, %v3276_v60  ;;  %v5854_v24 = vmax.f32 %v4344_v13, %v4348_v15  ;;  %v5858_v44 = vld [vmem:[#allocation41_spill] sm:$0xff] }
 0x2ef   : > { %v3280_v42 = vpop.eup %3279  ;;  %1790 = vxpose.xlu0.c.b16.cont [6/8] %v1779_v36, 128  ;;  %v1780_v39 = vpack.c.bf16 %v1744_v61, %v1742_v38  ;;  %v1747_v47 = vadd.f32 0.0001, %v3278_v26  ;;  %v5855_v37 = vmax.f32 %v4352_v17, %v4358_v22  ;;  %v5856_v23 = vmax.f32 %v4364_v25, %v4368_v20  ;;  %v5861_v34 = vld [vmem:[#allocation45_spill] sm:$0xff]  ;;  %v5862_v38 = vld [vmem:[#allocation47_spill] sm:$0xff] }
 0x2f0   : > { %v2234_v16 = vadd.f32 %v2233_v57, %v1744_v61  ;;  %v2214_v40 = vadd.f32 %v2213_v30, %v1745_v10  ;;  %v1746_v0 = vadd.f32 0.0001, %v3280_v42  ;;  %v5857_v6 = vmax.f32 %v4372_v27, %v4378_v32  ;;  %v5864_v36 = vld [vmem:[#allocation25_spill] sm:$0xff]  ;;  %v5865_v61 = vld [vmem:[#allocation27_spill] sm:$0xff]  ;;  %v5867_v30 = vld [vmem:[#allocation32_spill] sm:$0xff] }
 0x2f1   : > { %v3282_v48 = vpop.eup %3281  ;;  %1806 = vxpose.xlu1.c.b16.cont [6/8] %v1780_v39, 128  ;;  %v1781_v33 = vpack.c.bf16 %v1747_v47, %v1745_v10  ;;  %v5860_v52 = vmax.f32 %v5858_v44, %v5859_v58  ;;  %v5863_v60 = vmax.f32 %v5861_v34, %v5862_v38  ;;  %v5866_v26 = vmax.f32 %v5864_v36, %v5865_v61  ;;  %v5868_v57 = vld [vmem:[#allocation33_spill] sm:$0xff]  ;;  %v5870_v42 = vld [vmem:[#allocation34_spill] sm:$0xff]  ;;  %v5871_v39 = vld [vmem:[#allocation35_spill] sm:$0xff] }
 0x2f2   : > { %v3284_v1 = vpop.eup %3283  ;;  %v1748_v11 = vadd.f32 0.0001, %v3282_v48  ;;  %v2215_v43 = vadd.f32 %v2214_v40, %v1747_v47  ;;  %v2235_v55 = vadd.f32 %v2234_v16, %v1746_v0  ;;  %v5869_v10 = vmax.f32 %v5867_v30, %v5868_v57  ;;  %v5873_v48 = vld [vmem:[#allocation36_spill] sm:$0xff]  ;;  %v5874_v16 = vld [vmem:[#allocation37_spill] sm:$0xff] }
 0x2f3   : > { %v3286_v63 = vpop.eup %3285  ;;  %v1749_v59 = vadd.f32 0.0001, %v3284_v1  ;;  %1791 = vxpose.xlu0.c.b16.cont [7/8] %v1781_v33, 128  ;;  %v5872_v47 = vmax.f32 %v5870_v42, %v5871_v39  ;;  %v5875_v40 = vmax.f32 %v5873_v48, %v5874_v16  ;;  %v5877_v1 = vld [vmem:[#allocation39_spill] sm:$0xff] }
 0x2f4   : > { %v3288_v18 = vpop.eup %3287  ;;  %v1782_v19 = vpack.c.bf16 %v1748_v11, %v1746_v0  ;;  %v1751_v62 = vadd.f32 0.0001, %v3286_v63  ;;  %v2236_v49 = vadd.f32 %v2235_v55, %v1748_v11  ;;  %v5876_v0 = vld [vmem:[#allocation38_spill] sm:$0xff]  ;;  %v5879_v11 = vld [vmem:[#allocation44_spill] sm:$0xff]  ;;  %v4981_v55 = vld [vmem:[#allocation11] sm:$0xff]  }
 0x2f5   : > { %v3290_v53 = vpop.eup %3289  ;;  %v2216_v50 = vadd.f32 %v2215_v43, %v1749_v59  ;;  %v1750_v4 = vadd.f32 0.0001, %v3288_v18  ;;  %v5878_v33 = vmax.f32 %v5876_v0, %v5877_v1  ;;  %v5880_v63 = vld [vmem:[#allocation46_spill] sm:$0xff] }
 0x2f6   : > { %1807 = vxpose.xlu1.c.b16.cont [7/8] %v1782_v19, 128  ;;  %v1783_v29 = vpack.c.bf16 %v1751_v62, %v1749_v59  ;;  %v1752_v3 = vadd.f32 0.0001, %v3290_v53  ;;  %v5881_v43 = vmax.f32 %v5879_v11, %v5880_v63  ;;  %v4983_v18 = vld [vmem:[#allocation11 + $0x48] sm:$0xff]   ;;  %v4987_v53 = vld [vmem:[#allocation11 + $0x50] sm:$0xff]  }
 0x2f7   : > { %v4926_v12 = vadd.f32 %v2216_v50, %v1751_v62  ;;  %v2237_v5 = vadd.f32 %v2236_v49, %v1750_v4  ;;  %v4985_v19 = vld [vmem:[#allocation11 + $0x8] sm:$0xff]   ;;  %5882 = vst [vmem:[#allocation49_spill] sm:$0xff] %v4987_v53  ;;  %v4991_v49 = vld [vmem:[#allocation11 + $0x10] sm:$0xff]  }
 0x2f8   : > { %1792 = vxpose.xlu0.c.b16.end [8/8] %v1783_v29, 128  ;;  %v1784_v21 = vpack.c.bf16 %v1752_v3, %v1750_v4  ;;  %v4993_v4 = vld [vmem:[#allocation11 + $0x58] sm:$0xff]  }
 0x2f9   : > { %v4928_v14 = vadd.f32 %v2237_v5, %v1752_v3  ;;  %v4997_v29 = vld [vmem:[#allocation11 + $0x18] sm:$0xff]   ;;  %v4999_v5 = vld [vmem:[#allocation11 + $0x60] sm:$0xff]  }
 0x2fa   : > { %1808 = vxpose.xlu1.c.b16.end [8/8] %v1784_v21, 128  ;;  %5883 = vst [vmem:[#allocation85_spill] sm:$0xff] %v4999_v5 }
 0x305   : > { %1368 = vmax.xlane.f32.xlu0 %v5845_v45  ;;  %v5003_v45 = vld [vmem:[#allocation11 + $0x20] sm:$0xff]  }
 0x307   : > { %1341 = vmax.xlane.f32.xlu1 %v5848_v41 }
 0x309   : > { %1383 = vmax.xlane.f32.xlu0 %v5851_v9  ;;  %v5005_v9 = vld [vmem:[#allocation11 + $0x68] sm:$0xff]  }
 0x30a   : > { %5884 = vst [vmem:[#allocation86_spill] sm:$0xff] %v5005_v9 }
 0x30b   : > { %1344 = vmax.xlane.f32.xlu1 %v5853_v7  ;;  %v5009_v7 = vld [vmem:[#allocation11 + $0x28] sm:$0xff]  }
 0x30f   : > { %1347 = vmax.xlane.f32.xlu1 %v5854_v24 }
 0x313   : > { %1350 = vmax.xlane.f32.xlu1 %v5855_v37  ;;  %v5011_v37 = vld [vmem:[#allocation11 + $0x70] sm:$0xff]  }
 0x314   : > { %5885 = vst [vmem:[#allocation87_spill] sm:$0xff] %v5011_v37 }
 0x317   : > { %1353 = vmax.xlane.f32.xlu1 %v5856_v23 }
 0x31b   : > { %1356 = vmax.xlane.f32.xlu1 %v5857_v6  ;;  %v5015_v6 = vld [vmem:[#allocation11 + $0x30] sm:$0xff]  }
 0x31f   : > { %1359 = vmax.xlane.f32.xlu1 %v5860_v52 }
 0x323   : > { %1362 = vmax.xlane.f32.xlu1 %v5863_v60  ;;  %v5017_v60 = vld [vmem:[#allocation11 + $0x78] sm:$0xff]  }
 0x324   : > { %5886 = vst [vmem:[#allocation62_spill] sm:$0xff] %v5017_v60 }
 0x327   : > { %1365 = vmax.xlane.f32.xlu1 %v5866_v26 }
 0x32b   : > { %1371 = vmax.xlane.f32.xlu1 %v5869_v10  ;;  %v5021_v10 = vld [vmem:[#allocation11 + $0x38] sm:$0xff]  }
 0x32f   : > { %1374 = vmax.xlane.f32.xlu1 %v5872_v47 }
 0x333   : > { %1377 = vmax.xlane.f32.xlu1 %v5875_v40 }
 0x337   : > { %1380 = vmax.xlane.f32.xlu1 %v5878_v33 }
 0x33b   : > { %1386 = vmax.xlane.f32.xlu1 %v5881_v43 }
 0x342   : > { %v1793_v59 = vpop.trf.xlu0 }
 0x343   : > { %2981 = vmatprep.mubr.bf16.mxu0 %v1793_v59 }
 0x344   : > { %v1809_v21 = vpop.trf.xlu1 }
 0x346   : > { %v1794_v62 = vpop.trf.xlu0 }
 0x347   : > { %2982 = vmatmul.mubr.bf16.vlgmr.msra.gmra.mrb[48].mxu0 %v1794_v62 }
 0x348   : > { %2902 = vmatpush3.bf16.msra.mxu0 %v4981_v55  ;;  %v1810_v23 = vpop.trf.xlu1 }
 0x349   : > { %2903 = vmatprep.subr.bf16.mxu0 %v4983_v18 }
 0x34a   : > { %v1795_v50 = vpop.trf.xlu0 }
 0x34b   : > { %2985 = vmatprep.mubr.bf16.mxu0 %v1795_v50  ;;  %v2218_v50 = vrot.slane %v4926_v12, 4 }
 0x34c   : > { %2904 = vmatpush3.bf16.msra.mxu0 %v4985_v19  ;;  %v1811_v26 = vpop.trf.xlu1 }
 0x34d   : > { %2905 = vmatprep.subr.bf16.mxu0 %v4987_v53 }
 0x34e   : > { %v1796_v3 = vpop.trf.xlu0 }
 0x34f   : > { %2986 = vmatmul.mubr.bf16.gmra.mrb[52].mxu0 %v1796_v3  ;;  %v2239_v3 = vrot.slane %v4928_v14, 4 }
 0x350   : > { %2906 = vmatpush3.bf16.msra.mxu0 %v4991_v49  ;;  %v1812_v40 = vpop.trf.xlu1 }
 0x351   : > { %2907 = vmatprep.subr.bf16.mxu0 %v4993_v4 }
 0x352   : > { %v1797_v41 = vpop.trf.xlu0 }
 0x353   : > { %2989 = vmatprep.mubr.bf16.mxu0 %v1797_v41 }
 0x354   : > { %2908 = vmatpush3.bf16.msra.mxu0 %v4997_v29  ;;  %v1813_v33 = vpop.trf.xlu1 }
 0x355   : > { %2909 = vmatprep.subr.bf16.mxu0 %v4999_v5 }
 0x356   : > { %v1798_v24 = vpop.trf.xlu0 }
 0x357   : > { %2990 = vmatmul.mubr.bf16.gmra.mrb[56].mxu0 %v1798_v24  ;;  %v5887_v24 = vld [vmem:[#allocation69_spill] sm:$0xff] }
 0x358   : > { %2910 = vmatpush3.bf16.msra.mxu0 %v5003_v45  ;;  %v1814_v43 = vpop.trf.xlu1 }
 0x359   : > { %2911 = vmatprep.subr.bf16.mxu0 %v5005_v9 }
 0x35a   : > { %v1799_v52 = vpop.trf.xlu0 }
 0x35b   : > { %2993 = vmatprep.mubr.bf16.mxu0 %v1799_v52 }
 0x35c   : > { %2912 = vmatpush3.bf16.msra.mxu0 %v5009_v7  ;;  %v1815_v59 = vpop.trf.xlu1 }
 0x35d   : > { %2913 = vmatprep.subr.bf16.mxu0 %v5011_v37  ;;  %v5891_v37 = vld [vmem:[#allocation48_spill] sm:$0xff] }
 0x35e   : > { %v1800_v47 = vpop.trf.xlu0 }
 0x35f   : > { %2994 = vmatmul.mubr.bf16.gmra.mrb[60].mxu0 %v1800_v47 }
 0x360   : > { %2997 = vmatprep.mubr.bf16.mxu0 %v1809_v21  ;;  %2914 = vmatpush3.bf16.msra.mxu0 %v5015_v6  ;;  %v1816_v62 = vpop.trf.xlu1  ;;  %v2219_v21 = vadd.f32 %v2218_v50, %v4926_v12  ;;  %v5893_v12 = vld [vmem:[#allocation50_spill] sm:$0xff] }
 0x361   : > { %2915 = vmatprep.subr.bf16.mxu0 %v5017_v60  ;;  %v5892_v60 = vsub.f32 %v5846_v2, %v5891_v37  ;;  %v5894_v50 = vsub.f32 %v5847_v35, %v5893_v12  ;;  %v5899_v35 = vld [vmem:[#allocation51_spill] sm:$0xff] }
 0x362   : > { %v2220_v53 = vrot.slane %v2219_v21, 2 }
 0x364   : > { %2916 = vmatpush3.bf16.msra.mxu0 %v5021_v10 }
 0x367   : > { %2998 = vmatmul.mubr.bf16.gmra.mrb[64].mxu0 %v1810_v23  ;;  %v5888_v23 = vsub.f32 %v5843_v56, %v5887_v24 }
 0x368   : > { %3001 = vmatprep.mubr.bf16.mxu0 %v1811_v26  ;;  %v5889_v26 = vld [vmem:[#allocation70_spill] sm:$0xff] }
 0x369   : > { %v5890_v47 = vsub.f32 %v5844_v46, %v5889_v26  ;;  %v5895_v46 = vld [vmem:[#allocation81_spill] sm:$0xff] }
 0x36f   : > { %3002 = vmatmul.mubr.bf16.gmra.mrb[68].mxu0 %v1812_v40 }
 0x370   : > { %3005 = vmatprep.mubr.bf16.mxu0 %v1813_v33  ;;  %v2240_v33 = vadd.f32 %v2239_v3, %v4928_v14 }
 0x372   : > { %v2241_v3 = vrot.slane %v2240_v33, 2 }
 0x377   : > { %3006 = vmatmul.mubr.bf16.gmra.mrb[72].mxu0 %v1814_v43 }
 0x378   : > { %3009 = vmatprep.mubr.bf16.mxu0 %v1815_v59 }
 0x37f   : > { %3010 = vmatmul.mubr.bf16.gmra.mrb[76].mxu0 %v1816_v62 }
 0x392   : > { %v1369_v41 = vpop.xlane.xlu0 %1368 }
 0x393   : > { %v1483_v52 = vsub.f32 %v5888_v23, %v1369_v41  ;;  %v1484_v40 = vsub.f32 %v5890_v47, %v1369_v41  ;;  %v5896_v41 = vsub.f32 %v5849_v54, %v5895_v46  ;;  %v5900_v47 = vsub.f32 %v4332_v8, %v5899_v35  ;;  %v5905_v8 = vld [vmem:[#allocation54_spill] sm:$0xff] }
 0x394   : > { %v1342_v43 = vpop.xlane.xlu1 %1341 }
 0x395   : > { %v1533_v59 = vmul.f32 1.442695, %v1483_v52  ;;  %v1535_v62 = vmul.f32 1.442695, %v1484_v40  ;;  %v1465_v5 = vsub.f32 %v5892_v60, %v1342_v43  ;;  %v1466_v9 = vsub.f32 %v5894_v50, %v1342_v43  ;;  %v5897_v52 = vld [vmem:[#allocation82_spill] sm:$0xff] }
 0x396   : > { %v1384_v56 = vpop.xlane.xlu0 %1383  ;;  %v5898_v26 = vsub.f32 %v5850_v28, %v5897_v52  ;;  %v2242_v50 = vadd.f32 %v2241_v3, %v2240_v33  ;;  %v5907_v33 = vld [vmem:[#allocation55_spill] sm:$0xff] }
 0x397   : > { %3291 = vpow2.f32 %v1533_v59  ;;  %v1497_v24 = vmul.f32 1.442695, %v1465_v5  ;;  %v1499_v23 = vmul.f32 1.442695, %v1466_v9  ;;  %v1493_v14 = vsub.f32 %v5896_v41, %v1384_v56  ;;  %v5901_v5 = vld [vmem:[#allocation52_spill] sm:$0xff] }
 0x398   : > { %3293 = vpow2.f32 %v1535_v62  ;;  %v1494_v2 = vsub.f32 %v5898_v26, %v1384_v56  ;;  %v1345_v37 = vpop.xlane.xlu1 %1344  ;;  %v5902_v9 = vsub.f32 %v5852_v51, %v5901_v5  ;;  %v2221_v59 = vadd.f32 %v2220_v53, %v2219_v21  ;;  %v5903_v56 = vld [vmem:[#allocation53_spill] sm:$0xff] }
 0x399   : > { %3295 = vpow2.f32 %v1497_v24  ;;  %v1553_v60 = vmul.f32 1.442695, %v1493_v14  ;;  %v1467_v40 = vsub.f32 %v5900_v47, %v1345_v37  ;;  %v5904_v24 = vsub.f32 %v4344_v13, %v5903_v56  ;;  %v5911_v56 = vld [vmem:[#allocation57_spill] sm:$0xff] }
 0x39a   : > { %v1468_v43 = vsub.f32 %v5902_v9, %v1345_v37  ;;  %3297 = vpow2.f32 %v1499_v23  ;;  %v1555_v54 = vmul.f32 1.442695, %v1494_v2  ;;  %v5906_v41 = vsub.f32 %v4348_v15, %v5905_v8  ;;  %v5909_v37 = vld [vmem:[#allocation56_spill] sm:$0xff]  ;;  %v5913_v8 = vld [vmem:[#allocation58_spill] sm:$0xff] }
 0x39b   : > { %3299 = vpow2.f32 %v1553_v60  ;;  %v1501_v62 = vmul.f32 1.442695, %v1467_v40  ;;  %v2222_v51 = vrot.slane %v2221_v59, 1  ;;  %v2243_v23 = vrot.slane %v2242_v50, 1 }
 0x39c   : > { %v1503_v12 = vmul.f32 1.442695, %v1468_v43  ;;  %3301 = vpow2.f32 %v1555_v54  ;;  %v1348_v28 = vpop.xlane.xlu1 %1347  ;;  %v5908_v3 = vsub.f32 %v4352_v17, %v5907_v33  ;;  %v5910_v13 = vsub.f32 %v4358_v22, %v5909_v37 }
 0x39d   : > { %3303 = vpow2.f32 %v1501_v62  ;;  %v1469_v46 = vsub.f32 %v5904_v24, %v1348_v28  ;;  %v1470_v14 = vsub.f32 %v5906_v41, %v1348_v28  ;;  %v5066_v47 = vadd.f32 %v2222_v51, %v2221_v59 }
 0x39e   : > { %3305 = vpow2.f32 %v1503_v12  ;;  %v5072_v62 = vadd.f32 %v2243_v23, %v2242_v50  ;;  %v5912_v24 = vsub.f32 %v4364_v25, %v5911_v56  ;;  %v5914_v41 = vsub.f32 %v4368_v20, %v5913_v8 }
 0x39f   : > { %v1505_v53 = vmul.f32 1.442695, %v1469_v46  ;;  %v1507_v21 = vmul.f32 1.442695, %v1470_v14 }
 0x3a0   : > { %v1351_v52 = vpop.xlane.xlu1 %1350 }
 0x3a1   : > { %v3292_v26 = vpop.eup %3291  ;;  %3307 = vpow2.f32 %v1505_v53  ;;  %v1471_v2 = vsub.f32 %v5908_v3, %v1351_v52  ;;  %v1472_v60 = vsub.f32 %v5910_v13, %v1351_v52 }
 0x3a2   : > { %v3294_v35 = vpop.eup %3293  ;;  %v5068_v15 = vadd.f32 0.0001, %v3292_v26  ;;  %3309 = vpow2.f32 %v1507_v21 }
 0x3a3   : > { %v3296_v40 = vpop.eup %3295  ;;  %v5070_v5 = vadd.f32 0.0001, %v3294_v35  ;;  %v1509_v9 = vmul.f32 1.442695, %v1471_v2  ;;  %v1511_v43 = vmul.f32 1.442695, %v1472_v60 }
 0x3a4   : > { %v3298_v54 = vpop.eup %3297  ;;  %v5074_v17 = vadd.f32 0.0001, %v3296_v40  ;;  %v1354_v12 = vpop.xlane.xlu1 %1353  ;;  %v5078_v22 = vmul.f32 %v5066_v47, %v5068_v15  ;;  %v5917_v60 = vld [vmem:[#allocation59_spill] sm:$0xff] }
 0x3a5   : > { %v3300_v59 = vpop.eup %3299  ;;  %v1562_v28 = vadd.f32 0.0001, %v3298_v54  ;;  %3311 = vpow2.f32 %v1509_v9  ;;  %v1473_v46 = vsub.f32 %v5912_v24, %v1354_v12  ;;  %v1474_v14 = vsub.f32 %v5914_v41, %v1354_v12  ;;  %v5919_v9 = vld [vmem:[#allocation60_spill] sm:$0xff] }
 0x3a6   : > { %v3302_v50 = vpop.eup %3301  ;;  %v2245_v51 = vmul.f32 %v5066_v47, %v5074_v17  ;;  %v5088_v53 = vadd.f32 0.0001, %v3300_v59  ;;  %3313 = vpow2.f32 %v1511_v43  ;;  %v5092_v21 = vmul.f32 %v5072_v62, %v5070_v5 }
 0x3a7   : > { %v3304_v23 = vpop.eup %3303  ;;  %v5094_v52 = vadd.f32 0.0001, %v3302_v50  ;;  %v1513_v25 = vmul.f32 1.442695, %v1473_v46  ;;  %v1515_v26 = vmul.f32 1.442695, %v1474_v14  ;;  %v2246_v33 = vmul.f32 %v5072_v62, %v1562_v28 }
 0x3a8   : > { %5915 = vst [vmem:[#allocation88_spill] sm:$0xff] %v5088_v53  ;;  %v3306_v20 = vpop.eup %3305  ;;  %v5097_v3 = vadd.f32 0.0001, %v3304_v23  ;;  %v1357_v2 = vpop.xlane.xlu1 %1356  ;;  %v5101_v37 = vmul.f32 %v5066_v47, %v5088_v53  ;;  %v5918_v35 = vsub.f32 %v4372_v27, %v5917_v60  ;;  %v5920_v43 = vsub.f32 %v4378_v32, %v5919_v9  ;;  %v5923_v60 = vld [vmem:[#allocation63_spill] sm:$0xff] }
 0x3a9   : > { %5916 = vst [vmem:[#allocation89_spill] sm:$0xff] %v5094_v52  ;;  %v1564_v13 = vadd.f32 0.0001, %v3306_v20  ;;  %3315 = vpow2.f32 %v1513_v25  ;;  %v5115_v56 = vmul.f32 %v5072_v62, %v5094_v52  ;;  %v2049_v53 = vunpack.c.h.bf16 %v4993_v4 }
 0x3aa   : > { %v1475_v40 = vsub.f32 %v5918_v35, %v1357_v2  ;;  %v1476_v54 = vsub.f32 %v5920_v43, %v1357_v2  ;;  %v2247_v59 = vmul.f32 %v5066_v47, %v5097_v3  ;;  %3317 = vpow2.f32 %v1515_v26  ;;  %v5921_v26 = vld [vmem:[#allocation61_spill] sm:$0xff] }
 0x3ab   : > { %v3308_v24 = vpop.eup %3307  ;;  %v2248_v27 = vmul.f32 %v5072_v62, %v1564_v13  ;;  %v1754_v41 = vpack.c.bf16 %v1564_v13, %v1562_v28  ;;  %v5922_v20 = vsub.f32 %v5858_v44, %v5921_v26  ;;  %v5924_v35 = vsub.f32 %v5859_v58, %v5923_v60  ;;  %v5925_v58 = vld [vmem:[#allocation64_spill] sm:$0xff] }
 0x3ac   : > { %v1517_v46 = vmul.f32 1.442695, %v1475_v40  ;;  %v1519_v8 = vmul.f32 1.442695, %v1476_v54  ;;  %v3310_v14 = vpop.eup %3309  ;;  %v2277_v32 = vpack.c.bf16 %v2247_v59, %v2245_v51  ;;  %v5118_v50 = vadd.f32 0.0001, %v3308_v24  ;;  %v1360_v23 = vpop.xlane.xlu1 %1359 }
 0x3ad   : > { %v5120_v25 = vadd.f32 0.0001, %v3310_v14  ;;  %v1477_v2 = vsub.f32 %v5922_v20, %v1360_v23  ;;  %v1478_v40 = vsub.f32 %v5924_v35, %v1360_v23  ;;  %2138 = vmatprep.mubr.bf16.mxu1 %v1754_v41  ;;  %v2278_v9 = vpack.c.bf16 %v2248_v27, %v2246_v33  ;;  %v5927_v27 = vld [vmem:[#allocation65_spill] sm:$0xff] }
 0x3ae   : > { %3319 = vpow2.f32 %v1517_v46  ;;  %v2249_v28 = vmul.f32 %v5066_v47, %v5118_v50  ;;  %v5926_v33 = vsub.f32 %v5861_v34, %v5925_v58  ;;  %v5928_v41 = vsub.f32 %v5862_v38, %v5927_v27 }
 0x3af   : > { %3321 = vpow2.f32 %v1519_v8  ;;  %v3312_v51 = vpop.eup %3311  ;;  %v1521_v13 = vmul.f32 1.442695, %v1477_v2  ;;  %v1523_v43 = vmul.f32 1.442695, %v1478_v40  ;;  %v2250_v54 = vmul.f32 %v5072_v62, %v5120_v25  ;;  %2421 = vmatprep.mubr.bf16.mxu0 %v2278_v9 }
 0x3b0   : > { %v3314_v59 = vpop.eup %3313  ;;  %v5132_v24 = vadd.f32 0.0001, %v3312_v51  ;;  %v1363_v44 = vpop.xlane.xlu1 %1362  ;;  %2422 = vmatmul.mubr.bf16.vlgmr.msra.gmra.mrb[80].mxu0 %v2277_v32  ;;  %v2040_v38 = vunpack.c.l.bf16 %v5021_v10 }
 0x3b1   : > { %v5134_v46 = vadd.f32 0.0001, %v3314_v59  ;;  %3323 = vpow2.f32 %v1521_v13  ;;  %v1479_v8 = vsub.f32 %v5926_v33, %v1363_v44  ;;  %v1480_v14 = vsub.f32 %v5928_v41, %v1363_v44  ;;  %v5929_v13 = vld [vmem:[#allocation66_spill] sm:$0xff]  ;;  %v5931_v44 = vld [vmem:[#allocation68_spill] sm:$0xff] }
 0x3b2   : > { %3325 = vpow2.f32 %v1523_v43  ;;  %v2251_v23 = vmul.f32 %v5066_v47, %v5132_v24  ;;  %v5930_v43 = vsub.f32 %v5864_v36, %v5929_v13  ;;  %v5932_v58 = vsub.f32 %v5865_v61, %v5931_v44  ;;  %v5933_v61 = vld [vmem:[#allocation71_spill] sm:$0xff] }
 0x3b3   : > { %v3316_v20 = vpop.eup %3315  ;;  %v1525_v2 = vmul.f32 1.442695, %v1479_v8  ;;  %v1527_v60 = vmul.f32 1.442695, %v1480_v14  ;;  %v2252_v32 = vmul.f32 %v5072_v62, %v5134_v46 }
 0x3b4   : > { %v3318_v35 = vpop.eup %3317  ;;  %v5148_v34 = vadd.f32 0.0001, %v3316_v20  ;;  %v1366_v40 = vpop.xlane.xlu1 %1365  ;;  %v2279_v9 = vpack.c.bf16 %v2251_v23, %v2249_v28 }
 0x3b5   : > { %v5152_v51 = vadd.f32 0.0001, %v3318_v35  ;;  %3327 = vpow2.f32 %v1525_v2  ;;  %v1481_v59 = vsub.f32 %v5930_v43, %v1366_v40  ;;  %v1482_v33 = vsub.f32 %v5932_v58, %v1366_v40 }
 0x3b6   : > { %3329 = vpow2.f32 %v1527_v60  ;;  %v2280_v8 = vpack.c.bf16 %v2252_v32, %v2250_v54  ;;  %v2253_v27 = vmul.f32 %v5066_v47, %v5148_v34  ;;  %v5934_v54 = vsub.f32 %v5867_v30, %v5933_v61  ;;  %v5935_v32 = vld [vmem:[#allocation73_spill] sm:$0xff] }
 0x3b7   : > { %v1529_v41 = vmul.f32 1.442695, %v1481_v59  ;;  %v1531_v14 = vmul.f32 1.442695, %v1482_v33  ;;  %v2254_v23 = vmul.f32 %v5072_v62, %v5152_v51  ;;  %v5936_v40 = vsub.f32 %v5868_v57, %v5935_v32 }
 0x3b8   : > { %v3320_v28 = vpop.eup %3319  ;;  %2429 = vmatprep.mubr.bf16.mxu0 %v2280_v8  ;;  %v1372_v36 = vpop.xlane.xlu1 %1371 }
 0x3b9   : > { %v3322_v20 = vpop.eup %3321  ;;  %v5164_v2 = vadd.f32 0.0001, %v3320_v28  ;;  %3331 = vpow2.f32 %v1529_v41  ;;  %2430 = vmatmul.mubr.bf16.gmra.mrb[84].mxu0 %v2279_v9  ;;  %v1485_v60 = vsub.f32 %v5934_v54, %v1372_v36  ;;  %v1486_v13 = vsub.f32 %v5936_v40, %v1372_v36  ;;  %v5939_v54 = vld [vmem:[#allocation75_spill] sm:$0xff] }
 0x3ba   : > { %v5166_v35 = vadd.f32 0.0001, %v3322_v20  ;;  %3333 = vpow2.f32 %v1531_v14  ;;  %v5937_v20 = vld [vmem:[#allocation74_spill] sm:$0xff] }
 0x3bb   : > { %v2255_v43 = vmul.f32 %v5066_v47, %v5164_v2  ;;  %v3324_v44 = vpop.eup %3323  ;;  %v1537_v58 = vmul.f32 1.442695, %v1485_v60  ;;  %v1539_v33 = vmul.f32 1.442695, %v1486_v13  ;;  %v5938_v36 = vsub.f32 %v5870_v42, %v5937_v20 }
 0x3bc   : > { %v2256_v9 = vmul.f32 %v5072_v62, %v5166_v35  ;;  %v3326_v8 = vpop.eup %3325  ;;  %v5180_v30 = vadd.f32 0.0001, %v3324_v44  ;;  %v1375_v28 = vpop.xlane.xlu1 %1374  ;;  %v5940_v60 = vsub.f32 %v5871_v39, %v5939_v54  ;;  %v5941_v39 = vld [vmem:[#allocation76_spill] sm:$0xff] }
 0x3bd   : > { %v2281_v41 = vpack.c.bf16 %v2255_v43, %v2253_v27  ;;  %v5184_v14 = vadd.f32 0.0001, %v3326_v8  ;;  %3335 = vpow2.f32 %v1537_v58  ;;  %v1487_v61 = vsub.f32 %v5938_v36, %v1375_v28 }
 0x3be   : > { %v1488_v32 = vsub.f32 %v5940_v60, %v1375_v28  ;;  %3337 = vpow2.f32 %v1539_v33  ;;  %v2282_v40 = vpack.c.bf16 %v2256_v9, %v2254_v23  ;;  %v2257_v13 = vmul.f32 %v5066_v47, %v5180_v30  ;;  %v5943_v9 = vld [vmem:[#allocation78_spill] sm:$0xff] }
 0x3bf   : > { %v3328_v27 = vpop.eup %3327  ;;  %v1541_v43 = vmul.f32 1.442695, %v1487_v61  ;;  %v2258_v8 = vmul.f32 %v5072_v62, %v5184_v14  ;;  %v5942_v23 = vsub.f32 %v5873_v48, %v5941_v39  ;;  %v5944_v28 = vsub.f32 %v5874_v16, %v5943_v9 }
 0x3c0   : > { %v1543_v44 = vmul.f32 1.442695, %v1488_v32  ;;  %v3330_v58 = vpop.eup %3329  ;;  %v5196_v59 = vadd.f32 0.0001, %v3328_v27  ;;  %2437 = vmatprep.mubr.bf16.mxu0 %v2282_v40  ;;  %v1378_v42 = vpop.xlane.xlu1 %1377 }
 0x3c1   : > { %v5198_v20 = vadd.f32 0.0001, %v3330_v58  ;;  %3339 = vpow2.f32 %v1541_v43  ;;  %2438 = vmatmul.mubr.bf16.gmra.mrb[88].mxu0 %v2281_v41  ;;  %v1489_v33 = vsub.f32 %v5942_v23, %v1378_v42  ;;  %v1490_v36 = vsub.f32 %v5944_v28, %v1378_v42  ;;  %v5945_v42 = vld [vmem:[#allocation79_spill] sm:$0xff] }
 0x3c2   : > { %3341 = vpow2.f32 %v1543_v44  ;;  %v2259_v61 = vmul.f32 %v5066_v47, %v5196_v59  ;;  %v5946_v39 = vsub.f32 %v5876_v0, %v5945_v42 }
 0x3c3   : > { %v3332_v60 = vpop.eup %3331  ;;  %v1545_v32 = vmul.f32 1.442695, %v1489_v33  ;;  %v1547_v40 = vmul.f32 1.442695, %v1490_v36  ;;  %v2260_v41 = vmul.f32 %v5072_v62, %v5198_v20  ;;  %v5947_v33 = vld [vmem:[#allocation80_spill] sm:$0xff] }
 0x3c4   : > { %v3334_v27 = vpop.eup %3333  ;;  %v5212_v48 = vadd.f32 0.0001, %v3332_v60  ;;  %v1381_v43 = vpop.xlane.xlu1 %1380  ;;  %v2283_v58 = vpack.c.bf16 %v2259_v61, %v2257_v13  ;;  %v5948_v9 = vsub.f32 %v5877_v1, %v5947_v33  ;;  %v5951_v33 = vld [vmem:[#allocation84_spill] sm:$0xff] }
 0x3c5   : > { %v5216_v44 = vadd.f32 0.0001, %v3334_v27  ;;  %3343 = vpow2.f32 %v1545_v32  ;;  %v1491_v23 = vsub.f32 %v5946_v39, %v1381_v43  ;;  %v2284_v36 = vpack.c.bf16 %v2260_v41, %v2258_v8 }
 0x3c6   : > { %v1492_v28 = vsub.f32 %v5948_v9, %v1381_v43  ;;  %3345 = vpow2.f32 %v1547_v40  ;;  %v2261_v60 = vmul.f32 %v5066_v47, %v5212_v48  ;;  %v5949_v43 = vld [vmem:[#allocation83_spill] sm:$0xff]  ;;  %v5952_v9 = vsub.f32 %v5880_v63, %v5951_v33 }
 0x3c7   : > { %v3336_v61 = vpop.eup %3335  ;;  %v1549_v27 = vmul.f32 1.442695, %v1491_v23  ;;  %v2262_v32 = vmul.f32 %v5072_v62, %v5216_v44  ;;  %2445 = vmatprep.mubr.bf16.mxu0 %v2284_v36  ;;  %v5950_v39 = vsub.f32 %v5879_v11, %v5949_v43  ;;  %v2036_v8 = vunpack.c.l.bf16 %v5009_v7 }
 0x3c8   : > { %v1551_v54 = vmul.f32 1.442695, %v1492_v28  ;;  %v3338_v0 = vpop.eup %3337  ;;  %v5230_v42 = vadd.f32 0.0001, %v3336_v61  ;;  %v1387_v1 = vpop.xlane.xlu1 %1386  ;;  %v2285_v40 = vpack.c.bf16 %v5078_v22, %v2261_v60 }
 0x3c9   : > { %v5235_v41 = vadd.f32 0.0001, %v3338_v0  ;;  %3347 = vpow2.f32 %v1549_v27  ;;  %2446 = vmatmul.mubr.bf16.gmra.mrb[92].mxu0 %v2283_v58  ;;  %v1495_v23 = vsub.f32 %v5950_v39, %v1387_v1  ;;  %v1496_v28 = vsub.f32 %v5952_v9, %v1387_v1 }
 0x3ca   : > { %3349 = vpow2.f32 %v1551_v54  ;;  %v2286_v36 = vpack.c.bf16 %v5092_v21, %v2262_v32  ;;  %v2265_v22 = vmul.f32 %v5066_v47, %v5230_v42 }
 0x3cb   : > { %v3340_v60 = vpop.eup %3339  ;;  %v1557_v61 = vmul.f32 1.442695, %v1495_v23  ;;  %v1559_v0 = vmul.f32 1.442695, %v1496_v28  ;;  %v2266_v58 = vmul.f32 %v5072_v62, %v5235_v41 }
 0x3cc   : > { %v3342_v27 = vpop.eup %3341  ;;  %v5248_v13 = vadd.f32 0.0001, %v3340_v60  ;;  %2453 = vmatprep.mubr.bf16.mxu0 %v2286_v36 }
 0x3cd   : > { %v5250_v11 = vadd.f32 0.0001, %v3342_v27  ;;  %3351 = vpow2.f32 %v1557_v61 }
 0x3ce   : > { %3353 = vpow2.f32 %v1559_v0  ;;  %v2267_v63 = vmul.f32 %v5066_v47, %v5248_v13 }
 0x3cf   : > { %v3344_v54 = vpop.eup %3343  ;;  %v2268_v32 = vmul.f32 %v5072_v62, %v5250_v11 }
 0x3d0   : > { %v3346_v43 = vpop.eup %3345  ;;  %v5260_v39 = vadd.f32 0.0001, %v3344_v54  ;;  %v2287_v23 = vpack.c.bf16 %v2267_v63, %v2265_v22  ;;  %v2044_v54 = vunpack.c.l.bf16 %v4983_v18 }
 0x3d1   : > { %v5262_v33 = vadd.f32 0.0001, %v3346_v43  ;;  %2454 = vmatmul.mubr.bf16.gmra.mrb[96].mxu0 %v2285_v40  ;;  %v2288_v9 = vpack.c.bf16 %v2268_v32, %v2266_v58 }
 0x3d2   : > { %v2269_v28 = vmul.f32 %v5066_v47, %v5260_v39 }
 0x3d3   : > { %v3348_v36 = vpop.eup %3347  ;;  %2461 = vmatprep.mubr.bf16.mxu0 %v2288_v9  ;;  %v2270_v60 = vmul.f32 %v5072_v62, %v5262_v33 }
 0x3d4   : > { %v3350_v61 = vpop.eup %3349  ;;  %v5268_v0 = vadd.f32 0.0001, %v3348_v36 }
 0x3d5   : > { %v5270_v27 = vadd.f32 0.0001, %v3350_v61 }
 0x3d6   : > { %v2271_v22 = vmul.f32 %v5066_v47, %v5268_v0 }
 0x3d7   : > { %v3352_v58 = vpop.eup %3351  ;;  %v2272_v63 = vmul.f32 %v5072_v62, %v5270_v27 }
 0x3d8   : > { %v3354_v32 = vpop.eup %3353  ;;  %v5280_v43 = vadd.f32 0.0001, %v3352_v58  ;;  %v2289_v9 = vpack.c.bf16 %v2271_v22, %v2269_v28  ;;  %v2026_v22 = vunpack.c.l.bf16 %v4981_v55 }
 0x3d9   : > { %v5282_v36 = vadd.f32 0.0001, %v3354_v32  ;;  %2462 = vmatmul.mubr.bf16.gmra.mrb[100].mxu0 %v2287_v23  ;;  %v2290_v61 = vpack.c.bf16 %v2272_v63, %v2270_v60  ;;  %v2028_v23 = vunpack.c.l.bf16 %v4985_v19  ;;  %v2027_v63 = vunpack.c.h.bf16 %v4981_v55 }
 0x3da   : > { %5953 = vst [vmem:[#allocation90_spill] sm:$0xff] %v5280_v43  ;;  %v2275_v21 = vmul.f32 %v5066_v47, %v5280_v43  ;;  %v2029_v47 = vunpack.c.h.bf16 %v4985_v19  ;;  %v2033_v55 = vunpack.c.h.bf16 %v4997_v29 }
 0x3db   : > { %5954 = vst [vmem:[#allocation67_spill] sm:$0xff] %v5282_v36  ;;  %2469 = vmatprep.mubr.bf16.mxu0 %v2290_v61  ;;  %v2276_v1 = vmul.f32 %v5072_v62, %v5282_v36 }
 0x3dc   : > { %v2291_v58 = vpack.c.bf16 %v2275_v21, %v5101_v37 }
 0x3dd   : > { %v2292_v28 = vpack.c.bf16 %v2276_v1, %v5115_v56 }
 0x3e1   : > { %2470 = vmatmul.mubr.bf16.gmra.mrb[104].mxu0 %v2289_v9  ;;  %v2032_v9 = vunpack.c.l.bf16 %v4997_v29 }
 0x3e2   : > { %2477 = vmatprep.mubr.bf16.mxu0 %v2292_v28  ;;  %v2030_v28 = vunpack.c.l.bf16 %v4991_v49 }
 0x3e9   : > { %2478 = vmatmul.mubr.bf16.gmra.mrb[108].mxu0 %v2291_v58 }
 0x41a   : > { %v2983_v60 = vpop.f32.mrb[48].mxu0 }
 0x41b   : > { %v1899_v62 = vpop.f32.mrb[49].mxu0  ;;  %v5298_v61 = vmul.f32 %v2983_v60, %v2028_v23  ;;  %v2031_v23 = vunpack.c.h.bf16 %v4991_v49  ;;  %v2037_v49 = vunpack.c.h.bf16 %v5009_v7 }
 0x41c   : > { %v2984_v32 = vpop.f32.mrb[50].mxu0  ;;  %v5302_v56 = vmul.f32 %v2026_v22, %v1899_v62 }
 0x41d   : > { %v5300_v40 = vmul.f32 %v2984_v32, %v2029_v47  ;;  %v1902_v37 = vpop.f32.mrb[51].mxu0 }
 0x41e   : > { %v5304_v21 = vmul.f32 %v2027_v63, %v1902_v37 }
 0x422   : > { %v2987_v58 = vpop.f32.mrb[52].mxu0 }
 0x423   : > { %v1915_v47 = vpop.f32.mrb[53].mxu0  ;;  %v5314_v22 = vmul.f32 %v2987_v58, %v2032_v9  ;;  %v2034_v9 = vunpack.c.l.bf16 %v5003_v45 }
 0x424   : > { %v2988_v60 = vpop.f32.mrb[54].mxu0  ;;  %v5318_v32 = vmul.f32 %v2030_v28, %v1915_v47 }
 0x425   : > { %v5316_v63 = vmul.f32 %v2988_v60, %v2033_v55  ;;  %v1918_v62 = vpop.f32.mrb[55].mxu0  ;;  %v2035_v55 = vunpack.c.h.bf16 %v5003_v45  ;;  %v2041_v45 = vunpack.c.h.bf16 %v5021_v10  ;;  %v2048_v10 = vunpack.c.l.bf16 %v4993_v4 }
 0x426   : > { %v5320_v37 = vmul.f32 %v2031_v23, %v1918_v62  ;;  %v5957_v4 = vpack.c.bf16 %v5300_v40, %v5298_v61 }
 0x42a   : > { %v2991_v16 = vpop.f32.mrb[56].mxu0 }
 0x42b   : > { %v1931_v58 = vpop.f32.mrb[57].mxu0  ;;  %v5330_v47 = vmul.f32 %v2991_v16, %v2036_v8  ;;  %v2038_v16 = vunpack.c.l.bf16 %v5015_v6  ;;  %v2039_v8 = vunpack.c.h.bf16 %v5015_v6  ;;  %v2045_v6 = vunpack.c.h.bf16 %v4983_v18  ;;  %v5955_v18 = vld [vmem:[#allocation49_spill] sm:$0xff] }
 0x42c   : > { %v2992_v28 = vpop.f32.mrb[58].mxu0  ;;  %v5334_v62 = vmul.f32 %v2034_v9, %v1931_v58  ;;  %v2046_v52 = vunpack.c.l.bf16 %v5955_v18  ;;  %v2047_v36 = vunpack.c.h.bf16 %v5955_v18 }
 0x42d   : > { %v5332_v23 = vmul.f32 %v2992_v28, %v2037_v49  ;;  %v1934_v60 = vpop.f32.mrb[59].mxu0 }
 0x42e   : > { %v5336_v57 = vmul.f32 %v2035_v55, %v1934_v60 }
 0x432   : > { %v2995_v12 = vpop.f32.mrb[60].mxu0 }
 0x433   : > { %v1947_v49 = vpop.f32.mrb[61].mxu0  ;;  %v5346_v58 = vmul.f32 %v2995_v12, %v2040_v38  ;;  %v2042_v12 = vunpack.c.l.bf16 %v4930_v31  ;;  %v2043_v38 = vunpack.c.h.bf16 %v4930_v31 }
 0x434   : > { %v2996_v9 = vpop.f32.mrb[62].mxu0  ;;  %v5350_v60 = vmul.f32 %v2038_v16, %v1947_v49 }
 0x435   : > { %v5348_v55 = vmul.f32 %v2996_v9, %v2041_v45  ;;  %v1950_v28 = vpop.f32.mrb[63].mxu0 }
 0x436   : > { %v5352_v26 = vmul.f32 %v2039_v8, %v1950_v28 }
 0x43a   : > { %v2999_v29 = vpop.f32.mrb[64].mxu0 }
 0x43b   : > { %v1963_v45 = vpop.f32.mrb[65].mxu0  ;;  %v2076_v49 = vmul.f32 %v2999_v29, %v2044_v54  ;;  %v5956_v54 = vpack.c.bf16 %v5304_v21, %v5302_v56  ;;  %v5959_v56 = vld [vmem:[#allocation85_spill] sm:$0xff] }
 0x43c   : > { %v3000_v16 = vpop.f32.mrb[66].mxu0  ;;  %v2074_v28 = vmul.f32 %v2042_v12, %v1963_v45  ;;  %v2050_v21 = vunpack.c.l.bf16 %v5959_v56 }
 0x43d   : > { %v2077_v8 = vmul.f32 %v3000_v16, %v2045_v6  ;;  %v1966_v9 = vpop.f32.mrb[67].mxu0 }
 0x43e   : > { %v2075_v1 = vmul.f32 %v2043_v38, %v1966_v9 }
 0x43f   : > { %v2099_v7 = vpack.c.bf16 %v2077_v8, %v2076_v49  ;;  %v5958_v49 = vld [vmem:[#allocation86_spill] sm:$0xff] }
 0x440   : > { %v2098_v19 = vpack.c.bf16 %v2075_v1, %v2074_v28  ;;  %v2052_v8 = vunpack.c.l.bf16 %v5958_v49  ;;  %v2053_v9 = vunpack.c.h.bf16 %v5958_v49 }
 0x442   : > { %v3003_v43 = vpop.f32.mrb[68].mxu0  ;;  %2837 = vmatprep.subr.bf16.mxu1 %v2098_v19 }
 0x443   : > { %v1979_v31 = vpop.f32.mrb[69].mxu0  ;;  %2838 = vmatpush3.bf16.msra.mxu1 %v5956_v54  ;;  %v2080_v6 = vmul.f32 %v3003_v43, %v2048_v10  ;;  %v2051_v43 = vunpack.c.h.bf16 %v5959_v56  ;;  %v5961_v54 = vpack.c.bf16 %v5316_v63, %v5314_v22  ;;  %v5965_v56 = vpack.c.bf16 %v5332_v23, %v5330_v47 }
 0x444   : > { %v3004_v29 = vpop.f32.mrb[70].mxu0  ;;  %2839 = vmatprep.subr.bf16.mxu1 %v2099_v7  ;;  %v2078_v38 = vmul.f32 %v2046_v52, %v1979_v31  ;;  %v5960_v52 = vpack.c.bf16 %v5320_v37, %v5318_v32  ;;  %v5963_v32 = vld [vmem:[#allocation87_spill] sm:$0xff]  ;;  %v5970_v47 = vpack.c.bf16 %v5132_v24, %v5118_v50  ;;  %v5972_v23 = vpack.c.bf16 %v5164_v2, %v5148_v34 }
 0x445   : > { %v2081_v12 = vmul.f32 %v3004_v29, %v2049_v53  ;;  %v1982_v1 = vpop.f32.mrb[71].mxu0  ;;  %v2054_v37 = vunpack.c.l.bf16 %v5963_v32  ;;  %v5975_v50 = vpack.c.bf16 %v5070_v5, %v5216_v44  ;;  %v5977_v24 = vpack.c.bf16 %v5250_v11, %v5235_v41 }
 0x446   : > { %v2079_v45 = vmul.f32 %v2047_v36, %v1982_v1  ;;  %v5979_v5 = vpack.c.bf16 %v5270_v27, %v5262_v33  ;;  %v5980_v11 = vpack.c.bf16 %v5268_v0, %v5260_v39 }
 0x447   : > { %v2101_v16 = vpack.c.bf16 %v2081_v12, %v2080_v6  ;;  %2840 = vmatpush3.bf16.msra.mxu1 %v5957_v4  ;;  %v5962_v6 = vld [vmem:[#allocation62_spill] sm:$0xff]  ;;  %v5964_v4 = vpack.c.bf16 %v5336_v57, %v5334_v62  ;;  %v5967_v57 = vpack.c.bf16 %v5348_v55, %v5346_v58  ;;  %v5968_v62 = vpack.c.bf16 %v5097_v3, %v5074_v17  ;;  %v5981_v58 = vld [vmem:[#allocation67_spill] sm:$0xff]  ;;  %v5982_v55 = vld [vmem:[#allocation89_spill] sm:$0xff] }
 0x448   : > { %v2100_v19 = vpack.c.bf16 %v2079_v45, %v2078_v38  ;;  %v2056_v12 = vunpack.c.l.bf16 %v5962_v6  ;;  %v2057_v1 = vunpack.c.h.bf16 %v5962_v6  ;;  %v2055_v45 = vunpack.c.h.bf16 %v5963_v32 }
 0x449   : > { %v5973_v17 = vpack.c.bf16 %v5198_v20, %v5184_v14  ;;  %v5974_v3 = vpack.c.bf16 %v5196_v59, %v5180_v30  ;;  %v5978_v59 = vpack.c.bf16 %v5248_v13, %v5230_v42 }
 0x44a   : > { %v3007_v28 = vpop.f32.mrb[72].mxu0  ;;  %2841 = vmatprep.subr.bf16.mxu1 %v2100_v19 }
 0x44b   : > { %v1995_v53 = vpop.f32.mrb[73].mxu0  ;;  %2842 = vmatpush3.bf16.msra.mxu1 %v5960_v52  ;;  %v2084_v40 = vmul.f32 %v3007_v28, %v2052_v8 }
 0x44c   : > { %v3008_v36 = vpop.f32.mrb[74].mxu0  ;;  %2843 = vmatprep.subr.bf16.mxu1 %v2101_v16  ;;  %v2082_v10 = vmul.f32 %v2050_v21, %v1995_v53  ;;  %v5969_v53 = vpack.c.bf16 %v5134_v46, %v5120_v25  ;;  %v5976_v25 = vpack.c.bf16 %v5068_v15, %v5212_v48 }
 0x44d   : > { %v2085_v61 = vmul.f32 %v3008_v36, %v2053_v9  ;;  %v1998_v7 = vpop.f32.mrb[75].mxu0 }
 0x44e   : > { %v2083_v18 = vmul.f32 %v2051_v43, %v1998_v7  ;;  %v5966_v43 = vpack.c.bf16 %v5352_v26, %v5350_v60  ;;  %v5971_v26 = vpack.c.bf16 %v5166_v35, %v5152_v51  ;;  %v5983_v60 = vpack.c.bf16 %v5981_v58, %v5982_v55 }
 0x44f   : > { %v2103_v31 = vpack.c.bf16 %v2085_v61, %v2084_v40  ;;  %2844 = vmatpush3.bf16.msra.mxu1 %v5961_v54  ;;  %v5984_v40 = vld [vmem:[#allocation90_spill] sm:$0xff]  ;;  %v5985_v61 = vld [vmem:[#allocation88_spill] sm:$0xff] }
 0x450   : > { %v2102_v29 = vpack.c.bf16 %v2083_v18, %v2082_v10  ;;  %v5986_v7 = vpack.c.bf16 %v5984_v40, %v5985_v61 }
 0x452   : > { %v3011_v38 = vpop.f32.mrb[76].mxu0  ;;  %2845 = vmatprep.subr.bf16.mxu1 %v2102_v29 }
 0x453   : > { %v2011_v16 = vpop.f32.mrb[77].mxu0  ;;  %2846 = vmatpush3.bf16.msra.mxu1 %v5964_v4  ;;  %v2088_v22 = vmul.f32 %v3011_v38, %v2056_v12 }
 0x454   : > { %v3012_v19 = vpop.f32.mrb[78].mxu0  ;;  %2847 = vmatprep.subr.bf16.mxu1 %v2103_v31  ;;  %v2086_v8 = vmul.f32 %v2054_v37, %v2011_v16 }
 0x455   : > { %v2089_v63 = vmul.f32 %v3012_v19, %v2057_v1  ;;  %v2014_v49 = vpop.f32.mrb[79].mxu0 }
 0x456   : > { %v2087_v9 = vmul.f32 %v2055_v45, %v2014_v49 }
 0x457   : > { %v2105_v28 = vpack.c.bf16 %v2089_v63, %v2088_v22  ;;  %2848 = vmatpush3.bf16.msra.mxu1 %v5965_v56 }
 0x458   : > { %v2104_v21 = vpack.c.bf16 %v2087_v9, %v2086_v8 }
 0x45a   : > { %2849 = vmatprep.subr.bf16.mxu1 %v2104_v21 }
 0x45b   : > { %2850 = vmatpush3.bf16.msra.mxu1 %v5966_v43 }
 0x45c   : > { %2851 = vmatprep.subr.bf16.mxu1 %v2105_v28 }
 0x45f   : > { %2852 = vmatpush3.bf16.msra.mxu1 %v5967_v57 }
 0x462   : > { %2139 = vmatmul.mubr.bf16.vlgmr.msra.gmra.mrb[80].mxu1 %v5968_v62 }
 0x463   : > { %2146 = vmatprep.mubr.bf16.mxu1 %v5969_v53 }
 0x46a   : > { %2147 = vmatmul.mubr.bf16.gmra.mrb[84].mxu1 %v5970_v47 }
 0x46b   : > { %2154 = vmatprep.mubr.bf16.mxu1 %v5971_v26 }
 0x472   : > { %2155 = vmatmul.mubr.bf16.gmra.mrb[88].mxu1 %v5972_v23 }
 0x473   : > { %2162 = vmatprep.mubr.bf16.mxu1 %v5973_v17 }
 0x47a   : > { %2163 = vmatmul.mubr.bf16.gmra.mrb[92].mxu1 %v5974_v3 }
 0x47b   : > { %2170 = vmatprep.mubr.bf16.mxu1 %v5975_v50 }
 0x482   : > { %2171 = vmatmul.mubr.bf16.gmra.mrb[96].mxu1 %v5976_v25 }
 0x483   : > { %2178 = vmatprep.mubr.bf16.mxu1 %v5977_v24  ;;  %v2917_v46 = vpop.f32.mrb[80].mxu0 }
 0x484   : > { %v2918_v34 = vpop.f32.mrb[81].mxu0 }
 0x485   : > { %v2919_v51 = vadd.f32 %v2918_v34, %v2917_v46  ;;  %v2920_v2 = vpop.f32.mrb[82].mxu0 }
 0x486   : > { %v2921_v35 = vpop.f32.mrb[83].mxu0 }
 0x487   : > { %v2922_v14 = vadd.f32 %v2921_v35, %v2920_v2  ;;  %3355 = vrcp.f32 %v2919_v51 }
 0x489   : > { %3357 = vrcp.f32 %v2922_v14 }
 0x48a   : > { %2179 = vmatmul.mubr.bf16.gmra.mrb[100].mxu1 %v5978_v59 }
 0x48b   : > { %2186 = vmatprep.mubr.bf16.mxu1 %v5979_v5 }
 0x48c   : > { %v2923_v15 = vpop.f32.mrb[84].mxu0 }
 0x48d   : > { %v2924_v30 = vpop.f32.mrb[85].mxu0 }
 0x48e   : > { %v2925_v20 = vadd.f32 %v2924_v30, %v2923_v15  ;;  %v2926_v48 = vpop.f32.mrb[86].mxu0 }
 0x48f   : > { %v2927_v44 = vpop.f32.mrb[87].mxu0 }
 0x490   : > { %v2928_v41 = vadd.f32 %v2927_v44, %v2926_v48  ;;  %3359 = vrcp.f32 %v2925_v20 }
 0x491   : > { %v3356_v50 = vpop.eup %3355 }
 0x492   : > { %2187 = vmatmul.mubr.bf16.gmra.mrb[104].mxu1 %v5980_v11  ;;  %3361 = vrcp.f32 %v2928_v41 }
 0x493   : > { %2194 = vmatprep.mubr.bf16.mxu1 %v5983_v60  ;;  %v3358_v34 = vpop.eup %3357 }
 0x494   : > { %v2929_v13 = vpop.f32.mrb[88].mxu0 }
 0x495   : > { %v2930_v42 = vpop.f32.mrb[89].mxu0 }
 0x496   : > { %v2931_v52 = vadd.f32 %v2930_v42, %v2929_v13  ;;  %v2932_v36 = vpop.f32.mrb[90].mxu0 }
 0x497   : > { %v2933_v33 = vpop.f32.mrb[91].mxu0 }
 0x498   : > { %v2934_v27 = vadd.f32 %v2933_v33, %v2932_v36  ;;  %3363 = vrcp.f32 %v2931_v52 }
 0x49a   : > { %2195 = vmatmul.mubr.bf16.gmra.mrb[108].mxu1 %v5986_v7  ;;  %v3360_v5 = vpop.eup %3359  ;;  %3365 = vrcp.f32 %v2934_v27 }
 0x49c   : > { %v2935_v10 = vpop.f32.mrb[92].mxu0  ;;  %v3362_v48 = vpop.eup %3361 }
 0x49d   : > { %v2936_v18 = vpop.f32.mrb[93].mxu0 }
 0x49e   : > { %v2937_v31 = vadd.f32 %v2936_v18, %v2935_v10  ;;  %v2938_v54 = vpop.f32.mrb[94].mxu0 }
 0x49f   : > { %v2939_v39 = vpop.f32.mrb[95].mxu0 }
 0x4a0   : > { %v2940_v0 = vadd.f32 %v2939_v39, %v2938_v54  ;;  %3367 = vrcp.f32 %v2937_v31 }
 0x4a2   : > { %v3364_v60 = vpop.eup %3363  ;;  %3369 = vrcp.f32 %v2940_v0 }
 0x4a4   : > { %v2941_v29 = vpop.f32.mrb[96].mxu0  ;;  %v3366_v36 = vpop.eup %3365 }
 0x4a5   : > { %v2942_v6 = vpop.f32.mrb[97].mxu0 }
 0x4a6   : > { %v5443_v12 = vadd.f32 %v2942_v6, %v2941_v29  ;;  %v2944_v1 = vpop.f32.mrb[98].mxu0 }
 0x4a7   : > { %v2945_v38 = vpop.f32.mrb[99].mxu0 }
 0x4a8   : > { %v5445_v32 = vadd.f32 %v2945_v38, %v2944_v1  ;;  %3371 = vrcp.f32 %v5443_v12 }
 0x4aa   : > { %v3368_v10 = vpop.eup %3367  ;;  %3373 = vrcp.f32 %v5445_v32 }
 0x4ac   : > { %v2947_v37 = vpop.f32.mrb[100].mxu0  ;;  %v3370_v39 = vpop.eup %3369 }
 0x4ad   : > { %v2948_v45 = vpop.f32.mrb[101].mxu0 }
 0x4ae   : > { %v5447_v16 = vadd.f32 %v2948_v45, %v2947_v37  ;;  %v2950_v4 = vpop.f32.mrb[102].mxu0 }
 0x4af   : > { %v2951_v19 = vpop.f32.mrb[103].mxu0 }
 0x4b0   : > { %v5449_v22 = vadd.f32 %v2951_v19, %v2950_v4  ;;  %3375 = vrcp.f32 %v5447_v16 }
 0x4b2   : > { %v3372_v38 = vpop.eup %3371  ;;  %3377 = vrcp.f32 %v5449_v22 }
 0x4b4   : > { %v2953_v63 = vpop.f32.mrb[104].mxu0  ;;  %v3374_v4 = vpop.eup %3373 }
 0x4b5   : > { %v2954_v49 = vpop.f32.mrb[105].mxu0 }
 0x4b6   : > { %v5451_v8 = vadd.f32 %v2954_v49, %v2953_v63  ;;  %v2956_v9 = vpop.f32.mrb[106].mxu0 }
 0x4b7   : > { %v2957_v28 = vpop.f32.mrb[107].mxu0 }
 0x4b8   : > { %v5453_v56 = vadd.f32 %v2957_v28, %v2956_v9  ;;  %3379 = vrcp.f32 %v5451_v8 }
 0x4ba   : > { %v3376_v28 = vpop.eup %3375  ;;  %3381 = vrcp.f32 %v5453_v56 }
 0x4bc   : > { %v2959_v21 = vpop.f32.mrb[108].mxu0 }
 0x4bd   : > { %v2960_v43 = vpop.f32.mrb[109].mxu0 }
 0x4be   : > { %v5455_v57 = vadd.f32 %v2960_v43, %v2959_v21  ;;  %v2962_v62 = vpop.f32.mrb[110].mxu0 }
 0x4bf   : > { %v2963_v53 = vpop.f32.mrb[111].mxu0 }
 0x4c0   : > { %v5457_v47 = vadd.f32 %v2963_v53, %v2962_v62  ;;  %v3378_v62 = vpop.eup %3377  ;;  %3383 = vrcp.f32 %v5455_v57 }
 0x4c2   : > { %3385 = vrcp.f32 %v5457_v47 }
 0x535   : > { %v2853_v26 = vpop.f32.mrb[80].mxu1 }
 0x536   : > { %v2854_v23 = vpop.f32.mrb[81].mxu1 }
 0x537   : > { %v2855_v17 = vadd.f32 %v2854_v23, %v2853_v26  ;;  %v2856_v3 = vpop.f32.mrb[82].mxu1 }
 0x538   : > { %v2857_v25 = vpop.f32.mrb[83].mxu1 }
 0x539   : > { %v2502_v24 = vmul.f32 %v3356_v50, %v2855_v17  ;;  %v2858_v46 = vadd.f32 %v2857_v25, %v2856_v3  ;;  %v3380_v3 = vpop.eup %3379 }
 0x53b   : > { %2518 = vst [vmem:[%s5460_s18] sm:$0xff] %v2502_v24  ;;  %v2503_v51 = vmul.f32 %v3358_v34, %v2858_v46  ;;  %v3382_v24 = vpop.eup %3381 }
 0x53d   : > { %2519 = vst [vmem:[%s5460_s18 + $0x8] sm:$0xff] %v2503_v51  ;;  %v2859_v2 = vpop.f32.mrb[84].mxu1 }
 0x53e   : > { %v2860_v35 = vpop.f32.mrb[85].mxu1 }
 0x53f   : > { %v2861_v14 = vadd.f32 %v2860_v35, %v2859_v2  ;;  %v2862_v59 = vpop.f32.mrb[86].mxu1  ;;  %v3384_v35 = vpop.eup %3383 }
 0x540   : > { %v2863_v15 = vpop.f32.mrb[87].mxu1 }
 0x541   : > { %v2504_v30 = vmul.f32 %v3360_v5, %v2861_v14  ;;  %v2864_v20 = vadd.f32 %v2863_v15, %v2862_v59  ;;  %v3386_v5 = vpop.eup %3385 }
 0x543   : > { %2520 = vst [vmem:[%s5460_s18 + $0x10] sm:$0xff] %v2504_v30  ;;  %v2505_v44 = vmul.f32 %v3362_v48, %v2864_v20 }
 0x545   : > { %2521 = vst [vmem:[%s5460_s18 + $0x18] sm:$0xff] %v2505_v44  ;;  %v2865_v41 = vpop.f32.mrb[88].mxu1 }
 0x546   : > { %v2866_v11 = vpop.f32.mrb[89].mxu1 }
 0x547   : > { %v2867_v58 = vadd.f32 %v2866_v11, %v2865_v41  ;;  %v2868_v55 = vpop.f32.mrb[90].mxu1 }
 0x548   : > { %v2869_v13 = vpop.f32.mrb[91].mxu1 }
 0x549   : > { %v2506_v42 = vmul.f32 %v3364_v60, %v2867_v58  ;;  %v2870_v52 = vadd.f32 %v2869_v13, %v2868_v55 }
 0x54b   : > { %2522 = vst [vmem:[%s5460_s18 + $0x20] sm:$0xff] %v2506_v42  ;;  %v2507_v33 = vmul.f32 %v3366_v36, %v2870_v52 }
 0x54d   : > { %2523 = vst [vmem:[%s5460_s18 + $0x28] sm:$0xff] %v2507_v33  ;;  %v2871_v27 = vpop.f32.mrb[92].mxu1 }
 0x54e   : > { %v2872_v40 = vpop.f32.mrb[93].mxu1 }
 0x54f   : > { %v2873_v61 = vadd.f32 %v2872_v40, %v2871_v27  ;;  %v2874_v7 = vpop.f32.mrb[94].mxu1 }
 0x550   : > { %v2875_v18 = vpop.f32.mrb[95].mxu1 }
 0x551   : > { %v2508_v31 = vmul.f32 %v3368_v10, %v2873_v61  ;;  %v2876_v54 = vadd.f32 %v2875_v18, %v2874_v7 }
 0x553   : > { %2524 = vst [vmem:[%s5460_s18 + $0x30] sm:$0xff] %v2508_v31  ;;  %v2509_v0 = vmul.f32 %v3370_v39, %v2876_v54 }
 0x555   : > { %2525 = vst [vmem:[%s5460_s18 + $0x38] sm:$0xff] %v2509_v0  ;;  %v2877_v29 = vpop.f32.mrb[96].mxu1 }
 0x556   : > { %v2878_v6 = vpop.f32.mrb[97].mxu1 }
 0x557   : > { %v2879_v12 = vadd.f32 %v2878_v6, %v2877_v29  ;;  %v2880_v1 = vpop.f32.mrb[98].mxu1 }
 0x558   : > { %v2881_v37 = vpop.f32.mrb[99].mxu1 }
 0x559   : > { %v2510_v32 = vmul.f32 %v3372_v38, %v2879_v12  ;;  %v2882_v45 = vadd.f32 %v2881_v37, %v2880_v1 }
 0x55b   : > { %2526 = vst [vmem:[%s5460_s18 + $0x40] sm:$0xff] %v2510_v32  ;;  %v2511_v19 = vmul.f32 %v3374_v4, %v2882_v45 }
 0x55d   : > { %2527 = vst [vmem:[%s5460_s18 + $0x48] sm:$0xff] %v2511_v19  ;;  %v2883_v63 = vpop.f32.mrb[100].mxu1 }
 0x55e   : > { %v2884_v49 = vpop.f32.mrb[101].mxu1 }
 0x55f   : > { %v2885_v16 = vadd.f32 %v2884_v49, %v2883_v63  ;;  %v2886_v9 = vpop.f32.mrb[102].mxu1 }
 0x560   : > { %v2887_v21 = vpop.f32.mrb[103].mxu1 }
 0x561   : > { %v2512_v22 = vmul.f32 %v3376_v28, %v2885_v16  ;;  %v2888_v43 = vadd.f32 %v2887_v21, %v2886_v9 }
 0x563   : > { %2528 = vst [vmem:[%s5460_s18 + $0x50] sm:$0xff] %v2512_v22  ;;  %v2513_v53 = vmul.f32 %v3378_v62, %v2888_v43 }
 0x565   : > { %2529 = vst [vmem:[%s5460_s18 + $0x58] sm:$0xff] %v2513_v53  ;;  %v2889_v26 = vpop.f32.mrb[104].mxu1 }
 0x566   : > { %v2890_v23 = vpop.f32.mrb[105].mxu1 }
 0x567   : > { %v2891_v8 = vadd.f32 %v2890_v23, %v2889_v26  ;;  %v2892_v17 = vpop.f32.mrb[106].mxu1 }
 0x568   : > { %v2893_v56 = vpop.f32.mrb[107].mxu1 }
 0x569   : > { %v2514_v50 = vmul.f32 %v3380_v3, %v2891_v8  ;;  %v2894_v25 = vadd.f32 %v2893_v56, %v2892_v17 }
 0x56b   : > { %2530 = vst [vmem:[%s5460_s18 + $0x60] sm:$0xff] %v2514_v50  ;;  %v2515_v46 = vmul.f32 %v3382_v24, %v2894_v25 }
 0x56d   : > { %2531 = vst [vmem:[%s5460_s18 + $0x68] sm:$0xff] %v2515_v46  ;;  %v2895_v34 = vpop.f32.mrb[108].mxu1 }
 0x56e   : > { %v2896_v57 = vpop.f32.mrb[109].mxu1 }
 0x56f   : > { %v2897_v51 = vadd.f32 %v2896_v57, %v2895_v34  ;;  %v2898_v2 = vpop.f32.mrb[110].mxu1 }
 0x570   : > { %v2899_v14 = vpop.f32.mrb[111].mxu1 }
 0x571   : > { %v2516_v47 = vmul.f32 %v3384_v35, %v2897_v51  ;;  %v2900_v59 = vadd.f32 %v2899_v14, %v2898_v2 }
 0x573   : > { %2532 = vst [vmem:[%s5460_s18 + $0x70] sm:$0xff] %v2516_v47  ;;  %v2517_v15 = vmul.f32 %v3386_v5, %v2900_v59 }
 0x575   : > { %2533 = vst [vmem:[%s5460_s18 + $0x78] sm:$0xff] %v2517_v15 }
 0x576   : > { %3574 = shalt.err (!%p3571_p5)
}
 0x577   : > { %s3575_s24 = scalar_lea.hbm %s5489_s6, 2048  ;;  %s3579_s19 = scalar_lea.hbm %s5988_s13, 4096 }
 0x578   : > { %p3576_p8 = scmp.ne.s32.totalorder %s5489_s6, %s3575_s24  ;;  %p3580_p11 = scmp.lt.u32.totalorder %s5489_s6, %s5988_s13 }
 0x579   : > { %p3581_p13 = scmp.lt.u32.totalorder %s3579_s19, %s3575_s24  ;;  %p3583_p7 = scmp.lt.u32.totalorder %s3575_s24, %s5489_s6 }
 0x57a   : > { %p3577_p1 = pnand %p3576_p8, %p5989_p12 }
 0x57b   : > { %p3582_p3 = por %p3581_p13, %p3580_p11 }
 0x57c   : > { %p3578_p0 = pneg %p3577_p1 }
 0x57d   : > { %p3584_p2 = por %p3583_p7, %p3582_p3 }
 0x57f   : > { %p3585_p6 = pnand %p3584_p2, %p3578_p0 }
 0x581   : > { %3588 = shalt.err (!%p3585_p6)
}
 0x582   : > { %s3653_s28 = smov 128   ;;  %s3654_s11 = smov 8  }
 0x583   : > { %3047 = dma.vmem_to_hbm [thread:$0]  (%p5989_p12), %s5491_s17, 2048, %s5489_s6, %s2535_s25, %s3653_s28, %s3653_s28, %s3654_s11  }
 0x584 PF: > { %s5990_s7 = sld [smem:[#allocation19_spill]]  ;;  %s5991_s15 = sld [smem:[#allocation24_spill]] }
 0x585   : > { %s5992_s8 = sld [smem:[#allocation20_spill]] }
 0x58a   : > { %s2563_s18 = sand.u32 1, %s5990_s7   ;;  %p5993_p9 = scmp.ne.s32.totalorder %s5991_s15, 0 }
 0x58b   : > { %p5994_p10 = scmp.ge.s32.totalorder %s5992_s8, 2  ;;  %s2564_s10 = scalar_lea.sflag [#allocation4], %s2563_s18 }
 0x58d   : > { %p3070_p4 = pnand %p5994_p10, %p5993_p9 }
 0x58f   : > { %3622 = dma.done.wait (!%p3070_p4), %s2564_s10, 2048  }
 0x590   : > { %3624 = vsyncadd (!%p3070_p4), %s2564_s10, 4294965248  ;;  %s5995_s24 = sld [smem:[#allocation21_spill]]  ;;  %s5996_s30 = sld [smem:[#allocation22_spill]] }
 0x591   : > { %s5997_s21 = smov %s3631_s22  ;;  %s5998_s22 = smov %s3635_s23 }
 0x596   : > { %p24_p5 = scmp.ge.s32.totalorder %s5995_s24, 4   ;;  %s5999_s23 = smov %s5996_s30 }
 0x598   :  { %26 = sbr.rel (!%p24_p5) target bundleno = 13 (0xd), region = 125 }
 0x59f   :  { %2569 = vsyncpa [#allocation3], 1 }
 0x5a0   :  { %2571 = vsyncpa [#allocation3 + $0x1], 1 }
 0x5a1   :  { %2572 = vsyncpa [#allocation6], 1 }
 0x5a2   :  { %2574 = vsyncpa [#allocation6 + $0x1], 1 }
 0x5a3   :  { %2575 = vsyncpa [#allocation9], 1 }
 0x5a4   :  { %2576 = vsyncpa [#allocation12], 1 }
 0x5a5   :  { %2577 = vsyncpa [#allocation4], 1 }
 0x5a6   :  { %2579 = vsyncpa [#allocation4 + $0x1], 1 }

</bundles_post_ra>
